<compile_context>
chip_gen: v7x
topology: tpu7x:2x2x1
jax: 0.10.0
libtpu: 0.0.40
codegen_flags: <defaults>
</compile_context>

<pallas_src>
import jax
import jax.numpy as jnp
from jax import lax
from jax.experimental import pallas as pl
from jax.experimental.pallas import tpu as pltpu

_MIB = 1024 * 1024


def _vmem_limit_bytes():
    """Generation-aware VMEM limit: leave headroom below physical capacity."""
    cap = 64 * _MIB
    try:
        info = pltpu.get_tpu_info()
        cap = int(getattr(info, "vmem_capacity_bytes", cap))
    except Exception:
        pass
    # v7x (64 MiB phys) -> 48 MiB; v5e/v6e (128 MiB phys) -> 100 MiB.
    return int(max(32 * _MIB, min(cap - 16 * _MIB, 100 * _MIB)))


def _divisor_tile(n, cap):
    """Largest divisor of n <= cap, preferring multiples of 16, then 8."""
    cap = max(1, min(cap, n))
    cands = [t for t in range(cap, 0, -1) if n % t == 0]
    for mult in (16, 8, 1):
        for t in cands:
            if t % mult == 0:
                return t
    return cands[0]


def _attn_vmem_estimate(tq, n, c, dp, attn_bytes):
    """Rough per-step VMEM bytes for the attention call (double-buffered blocks
    plus f32 softmax temporaries)."""
    return (2 * tq * dp * 2            # q tile (bf16)
            + 2 * n * dp * 2           # resident k block (bf16)
            + 2 * n * c * 2            # resident v block (bf16)
            + 2 * tq * c * 4           # x residual tile (f32)
            + 2 * tq * c * 4           # y output tile (f32)
            + 2 * tq * n * attn_bytes  # attn output tile
            + 4 * tq * n * 4)          # scores / exp / attn f32 temporaries + slack


def _pick_q_tile(n, c, dp, attn_bytes, budget, cap=256):
    """Query tile: divisor of n, prefers multiples of 16, must fit the budget."""
    cap = max(1, min(cap, n))
    cands = [t for t in range(cap, 0, -1) if n % t == 0]
    for mult in (16, 8, 1):
        for t in cands:
            if t % mult == 0 and _attn_vmem_estimate(t, n, c, dp, attn_bytes) <= budget:
                return t
    return cands[-1]   # degenerate fallback (tiny tile); never VMEM-OOMs


def _make_proj_kernel(dp):
    """Fused QKV projection: one bf16 MXU matmul, f32 accumulate, bf16 outputs."""

    def kernel(x_ref, w_ref, b_ref, q_ref, k_ref, v_ref):
        xt = x_ref[0]                                                   # (TP, C) bf16
        qkv = jnp.dot(xt, w_ref[...],
                      preferred_element_type=jnp.float32) + b_ref[...]  # (TP, Fp) f32
        q_ref[0] = qkv[:, :dp].astype(jnp.bfloat16)           # scaled q, lane-128 stripe
        k_ref[0] = qkv[:, dp:2 * dp].astype(jnp.bfloat16)     # lane-128 stripe
        v_ref[0] = qkv[:, 2 * dp:].astype(jnp.bfloat16)       # (TP, C)

    return kernel


def _make_attn_kernel(attn_dtype):
    """Per query-tile attention: scores -> softmax (f32) -> attn @ v -> residual."""

    def kernel(q_ref, k_ref, v_ref, x_ref, gamma_ref, y_ref, attn_ref):
        q = q_ref[0]                                                    # (TQ, Dp) bf16
        k = k_ref[0]                                                    # (N,  Dp) bf16
        scores = lax.dot_general(q, k, (((1,), (1,)), ((), ())),
                                 preferred_element_type=jnp.float32)    # (TQ, N) f32
        m = jnp.max(scores, axis=-1, keepdims=True)
        e = jnp.exp(scores - m)
        denom = jnp.sum(e, axis=-1, keepdims=True)
        attn = e * pl.reciprocal(denom, approx=True)                    # EUP slot
        out = jnp.dot(attn.astype(jnp.bfloat16), v_ref[0],
                      preferred_element_type=jnp.float32)               # (TQ, C) f32
        y_ref[0] = gamma_ref[0, 0] * out + x_ref[0]
        attn_ref[0] = attn.astype(attn_dtype)

    return kernel


def self_attn_pallas(x, wq, bq, wk, bk, wv, bv, gamma, *, attn_dtype=jnp.bfloat16):
    """x: (B, C, H, W) float32 (NCHW, like PyTorch).

    wq, wk: (C//8, C, 1, 1); wv: (C, C, 1, 1); bq, bk: (C//8,); bv: (C,);
    gamma: (1,).  Returns (y, attn): y (B, C, H, W) f32, attn (B, N, N) attn_dtype.
    """
    B, C, H, W = x.shape
    N = H * W
    D = wq.shape[0]                              # C // 8
    Dp = max(128, ((D + 127) // 128) * 128)      # lane-128-padded q/k width
    Fp = 2 * Dp + C                              # fused projection width
    scale = 1.0 / float(C) ** 0.5
    attn_bytes = jnp.dtype(attn_dtype).itemsize

    # --- glue: channels-last layout; fused, zero-padded, pre-scaled weights ---
    x_flat = jnp.transpose(x.reshape(B, C, N), (0, 2, 1)).astype(jnp.float32)  # (B, N, C)
    x_bf16 = x_flat.astype(jnp.bfloat16)

    def pad_cols(w, width):
        return jnp.pad(w, ((0, 0), (0, width - w.shape[1])))

    wq_t = pad_cols(wq.reshape(D, C).astype(jnp.float32).T * scale, Dp)        # (C, Dp)
    wk_t = pad_cols(wk.reshape(D, C).astype(jnp.float32).T, Dp)                # (C, Dp)
    wv_t = wv.reshape(C, C).astype(jnp.float32).T                              # (C, C)
    w_qkv = jnp.concatenate([wq_t, wk_t, wv_t], axis=1).astype(jnp.bfloat16)   # (C, Fp)
    b_qkv = jnp.concatenate([
        jnp.pad(bq.astype(jnp.float32) * scale, (0, Dp - D)),
        jnp.pad(bk.astype(jnp.float32), (0, Dp - D)),
        bv.astype(jnp.float32),
    ]).reshape(1, Fp)                                                          # (1, Fp)
    gamma_r = gamma.reshape(1, 1).astype(jnp.float32)

    vmem_limit = _vmem_limit_bytes()

    # ------------------- call 1: fused QKV projection -------------------
    TP = _divisor_tile(N, 512)
    proj_cost = pl.CostEstimate(
        flops=2 * B * N * C * Fp,
        transcendentals=0,
        bytes_accessed=B * N * (C * 2 + Fp * 2) + C * Fp * 2,
    )
    q_p, k_p, v_p = pl.pallas_call(
        _make_proj_kernel(Dp),
        out_shape=(
            jax.ShapeDtypeStruct((B, N, Dp), jnp.bfloat16),
            jax.ShapeDtypeStruct((B, N, Dp), jnp.bfloat16),
            jax.ShapeDtypeStruct((B, N, C), jnp.bfloat16),
        ),
        grid=(B, N // TP),
        in_specs=[
            pl.BlockSpec((1, TP, C), lambda b, p: (b, p, 0)),      # x tile (bf16)
            pl.BlockSpec((C, Fp), lambda b, p: (0, 0)),            # fused W_qkv
            pl.BlockSpec((1, Fp), lambda b, p: (0, 0)),            # fused bias
        ],
        out_specs=(
            pl.BlockSpec((1, TP, Dp), lambda b, p: (b, p, 0)),
            pl.BlockSpec((1, TP, Dp), lambda b, p: (b, p, 0)),
            pl.BlockSpec((1, TP, C), lambda b, p: (b, p, 0)),
        ),
        compiler_params=pltpu.CompilerParams(
            dimension_semantics=("parallel", "parallel"),
            vmem_limit_bytes=vmem_limit,
        ),
        cost_estimate=proj_cost,
    )(x_bf16, w_qkv, b_qkv)

    # ------------------- call 2: flash-style attention -------------------
    TQ = _pick_q_tile(N, C, Dp, attn_bytes, budget=int(0.7 * vmem_limit))
    attn_cost = pl.CostEstimate(
        flops=2 * B * N * N * (Dp + C),
        transcendentals=B * N * N,
        bytes_accessed=(B * N * N * attn_bytes
                        + B * (N // TQ) * N * (Dp + C) * 2
                        + B * N * C * (4 + 4 + 2)),
    )
    y_flat, attn = pl.pallas_call(
        _make_attn_kernel(attn_dtype),
        out_shape=(
            jax.ShapeDtypeStruct((B, N, C), jnp.float32),
            jax.ShapeDtypeStruct((B, N, N), attn_dtype),
        ),
        grid=(B, N // TQ),
        in_specs=[
            pl.BlockSpec((1, TQ, Dp), lambda b, q: (b, q, 0)),     # q tile (scaled, bf16)
            pl.BlockSpec((1, N, Dp), lambda b, q: (b, 0, 0)),      # full k (revisited)
            pl.BlockSpec((1, N, C), lambda b, q: (b, 0, 0)),       # full v (revisited)
            pl.BlockSpec((1, TQ, C), lambda b, q: (b, q, 0)),      # residual x tile (f32)
            pl.BlockSpec(memory_space=pltpu.MemorySpace.SMEM),     # gamma scalar
        ],
        out_specs=(
            pl.BlockSpec((1, TQ, C), lambda b, q: (b, q, 0)),      # y tile
            pl.BlockSpec((1, TQ, N), lambda b, q: (b, q, 0)),      # attn tile (lane-dense)
        ),
        compiler_params=pltpu.CompilerParams(
            dimension_semantics=("parallel", "parallel"),
            vmem_limit_bytes=vmem_limit,
        ),
        cost_estimate=attn_cost,
    )(q_p, k_p, v_p, x_flat, gamma_r)

    y = jnp.transpose(y_flat, (0, 2, 1)).reshape(B, C, H, W)
    return y, attn


def self_attn_ref(x, wq, bq, wk, bk, wv, bv, gamma):
    """Pure-JAX f32 reference mirroring the PyTorch forward exactly."""
    B, C, H, W = x.shape
    N = H * W
    D = wq.shape[0]
    xf = x.reshape(B, C, N)
    q = jnp.einsum("dc,bcn->bdn", wq.reshape(D, C), xf) + bq[None, :, None]
    k = jnp.einsum("dc,bcn->bdn", wk.reshape(D, C), xf) + bk[None, :, None]
    v = jnp.einsum("dc,bcn->bdn", wv.reshape(C, C), xf) + bv[None, :, None]
    attn = jnp.einsum("bdi,bdj->bij", q, k) / jnp.sqrt(jnp.float32(C))
    attn = jax.nn.softmax(attn, axis=-1)
    out = jnp.einsum("bcj,bij->bci", v, attn).reshape(B, C, H, W)
    return gamma[0] * out + x, attn


if __name__ == "__main__":
    # Small deterministic problem: B=2, C=64 (C//8=8), H=W=16 -> N=256.
    key = jax.random.PRNGKey(0)
    k0, k1, k2, k3, k4, k5, k6 = jax.random.split(key, 7)

    B, C, H, W = 2, 64, 16, 16
    D = C // 8

    x = jax.random.normal(k0, (B, C, H, W), dtype=jnp.float32)
    wq = jax.random.normal(k1, (D, C, 1, 1), dtype=jnp.float32) * 0.1
    bq = jax.random.normal(k2, (D,), dtype=jnp.float32) * 0.1
    wk = jax.random.normal(k3, (D, C, 1, 1), dtype=jnp.float32) * 0.1
    bk = jax.random.normal(k4, (D,), dtype=jnp.float32) * 0.1
    wv = jax.random.normal(k5, (C, C, 1, 1), dtype=jnp.float32) * 0.1
    bv = jax.random.normal(k6, (C,), dtype=jnp.float32) * 0.1
    # PyTorch inits gamma to 0; use a nonzero value so the attention path
    # actually contributes to the output.
    gamma = jnp.full((1,), 0.5, dtype=jnp.float32)

    y, attn = jax.jit(self_attn_pallas)(x, wq, bq, wk, bk, wv, bv, gamma)
    jax.block_until_ready((y, attn))

    y_ref, attn_ref = self_attn_ref(x, wq, bq, wk, bk, wv, bv, gamma)
    # bf16 MXU inputs (f32 accumulate) + bf16 attn-map output -> relaxed tolerances.
    assert jnp.allclose(y, y_ref, atol=2e-2, rtol=2e-2), "output mismatch"
    assert jnp.allclose(attn.astype(jnp.float32), attn_ref,
                        atol=5e-3, rtol=5e-2), "attention mismatch"

    print("KERNEL_OK")
</pallas_src>

<mosaic_0001>
module attributes {stable_mosaic.version = 11 : i64} {
  func.func @kernel(%arg0: i32, %arg1: i32, %arg2: memref<1x256x64xbf16, #tpu.memory_space<vmem>>, %arg3: memref<64x320xbf16, #tpu.memory_space<vmem>>, %arg4: memref<1x320xf32, #tpu.memory_space<vmem>>, %arg5: memref<1x256x128xbf16, #tpu.memory_space<vmem>>, %arg6: memref<1x256x128xbf16, #tpu.memory_space<vmem>>, %arg7: memref<1x256x64xbf16, #tpu.memory_space<vmem>>) attributes {dimension_semantics = [#tpu.dimension_semantics<parallel>, #tpu.dimension_semantics<parallel>], iteration_bounds = array<i64: 2, 1>, scalar_prefetch = 0 : i64, scratch_operands = 0 : i64, tpu.core_type = #tpu.core_type<tc>, window_params = [{transform_indices = @transform_0, window_bounds = array<i64: 1, 256, 64>}, {pipeline_mode = #tpu.pipeline_mode<synchronous>, transform_indices = @transform_1, window_bounds = array<i64: 64, 320>}, {pipeline_mode = #tpu.pipeline_mode<synchronous>, transform_indices = @transform_2, window_bounds = array<i64: 1, 320>}, {transform_indices = @transform_3, window_bounds = array<i64: 1, 256, 128>}, {transform_indices = @transform_4, window_bounds = array<i64: 1, 256, 128>}, {transform_indices = @transform_5, window_bounds = array<i64: 1, 256, 64>}]} {
    %c0 = arith.constant 0 : index
    %c0_0 = arith.constant 0 : index
    %c0_1 = arith.constant 0 : index
    %0 = vector.load %arg2[%c0, %c0_0, %c0_1] : memref<1x256x64xbf16, #tpu.memory_space<vmem>>, vector<1x256x64xbf16>
    %1 = vector.shape_cast %0 : vector<1x256x64xbf16> to vector<256x64xbf16>
    %c0_2 = arith.constant 0 : index
    %c0_3 = arith.constant 0 : index
    %2 = vector.load %arg3[%c0_2, %c0_3] : memref<64x320xbf16, #tpu.memory_space<vmem>>, vector<64x320xbf16>
    %cst = arith.constant dense<0.000000e+00> : vector<256x320xf32>
    %3 = tpu.matmul %1, %2, %cst {dimension_numbers = #tpu.dot_dimension_numbers<[1], [0], [0], [1], [0, 0, 1, 1], [], []>} : vector<256x64xbf16>, vector<64x320xbf16>, vector<256x320xf32> -> vector<256x320xf32>
    %c0_4 = arith.constant 0 : index
    %c0_5 = arith.constant 0 : index
    %4 = vector.load %arg4[%c0_4, %c0_5] : memref<1x320xf32, #tpu.memory_space<vmem>>, vector<1x320xf32>
    %5 = vector.broadcast %4 : vector<1x320xf32> to vector<256x320xf32>
    %6 = arith.addf %3, %5 : vector<256x320xf32>
    %7 = vector.extract_strided_slice %6 {offsets = [0, 0], sizes = [256, 128], strides = [1, 1]} : vector<256x320xf32> to vector<256x128xf32>
    %8 = arith.truncf %7 : vector<256x128xf32> to vector<256x128xbf16>
    %c0_6 = arith.constant 0 : index
    %c0_7 = arith.constant 0 : index
    %c0_8 = arith.constant 0 : index
    %9 = vector.load %arg5[%c0_6, %c0_7, %c0_8] : memref<1x256x128xbf16, #tpu.memory_space<vmem>>, vector<1x256x128xbf16>
    %10 = vector.shape_cast %9 : vector<1x256x128xbf16> to vector<256x128xbf16>
    %11 = vector.shape_cast %8 : vector<256x128xbf16> to vector<1x256x128xbf16>
    tpu.vector_store %arg5[%c0_6, %c0_7, %c0_8], %11 {strides = array<i32>} : memref<1x256x128xbf16, #tpu.memory_space<vmem>>, vector<1x256x128xbf16>,
    %12 = vector.extract_strided_slice %6 {offsets = [0, 128], sizes = [256, 128], strides = [1, 1]} : vector<256x320xf32> to vector<256x128xf32>
    %13 = arith.truncf %12 : vector<256x128xf32> to vector<256x128xbf16>
    %c0_9 = arith.constant 0 : index
    %c0_10 = arith.constant 0 : index
    %c0_11 = arith.constant 0 : index
    %14 = vector.load %arg6[%c0_9, %c0_10, %c0_11] : memref<1x256x128xbf16, #tpu.memory_space<vmem>>, vector<1x256x128xbf16>
    %15 = vector.shape_cast %14 : vector<1x256x128xbf16> to vector<256x128xbf16>
    %16 = vector.shape_cast %13 : vector<256x128xbf16> to vector<1x256x128xbf16>
    tpu.vector_store %arg6[%c0_9, %c0_10, %c0_11], %16 {strides = array<i32>} : memref<1x256x128xbf16, #tpu.memory_space<vmem>>, vector<1x256x128xbf16>,
    %17 = vector.extract_strided_slice %6 {offsets = [0, 256], sizes = [256, 64], strides = [1, 1]} : vector<256x320xf32> to vector<256x64xf32>
    %18 = arith.truncf %17 : vector<256x64xf32> to vector<256x64xbf16>
    %c0_12 = arith.constant 0 : index
    %c0_13 = arith.constant 0 : index
    %c0_14 = arith.constant 0 : index
    %19 = vector.load %arg7[%c0_12, %c0_13, %c0_14] : memref<1x256x64xbf16, #tpu.memory_space<vmem>>, vector<1x256x64xbf16>
    %20 = vector.shape_cast %19 : vector<1x256x64xbf16> to vector<256x64xbf16>
    %21 = vector.shape_cast %18 : vector<256x64xbf16> to vector<1x256x64xbf16>
    tpu.vector_store %arg7[%c0_12, %c0_13, %c0_14], %21 {strides = array<i32>} : memref<1x256x64xbf16, #tpu.memory_space<vmem>>, vector<1x256x64xbf16>,
    return
  }
  func.func @transform_0(%arg0: i32, %arg1: i32) -> (i32, i32, i32) {
    %c0_i32 = arith.constant 0 : i32
    %c0_i32_0 = arith.constant 0 : i32
    return %arg0, %arg1, %c0_i32 : i32, i32, i32
  }
  func.func @transform_1(%arg0: i32, %arg1: i32) -> (i32, i32) {
    %c0_i32 = arith.constant 0 : i32
    %c0_i32_0 = arith.constant 0 : i32
    %c0_i32_1 = arith.constant 0 : i32
    return %c0_i32, %c0_i32_0 : i32, i32
  }
  func.func @transform_2(%arg0: i32, %arg1: i32) -> (i32, i32) {
    %c0_i32 = arith.constant 0 : i32
    %c0_i32_0 = arith.constant 0 : i32
    %c0_i32_1 = arith.constant 0 : i32
    return %c0_i32, %c0_i32_0 : i32, i32
  }
  func.func @transform_3(%arg0: i32, %arg1: i32) -> (i32, i32, i32) {
    %c0_i32 = arith.constant 0 : i32
    %c0_i32_0 = arith.constant 0 : i32
    return %arg0, %arg1, %c0_i32 : i32, i32, i32
  }
  func.func @transform_4(%arg0: i32, %arg1: i32) -> (i32, i32, i32) {
    %c0_i32 = arith.constant 0 : i32
    %c0_i32_0 = arith.constant 0 : i32
    return %arg0, %arg1, %c0_i32 : i32, i32, i32
  }
  func.func @transform_5(%arg0: i32, %arg1: i32) -> (i32, i32, i32) {
    %c0_i32 = arith.constant 0 : i32
    %c0_i32_0 = arith.constant 0 : i32
    return %arg0, %arg1, %c0_i32 : i32, i32, i32
  }
}

module attributes {stable_mosaic.version = 11 : i64} {
  func.func @kernel(%arg0: i32, %arg1: i32, %arg2: memref<1x256x128xbf16, #tpu.memory_space<vmem>>, %arg3: memref<1x256x128xbf16, #tpu.memory_space<vmem>>, %arg4: memref<1x256x64xbf16, #tpu.memory_space<vmem>>, %arg5: memref<1x256x64xf32, #tpu.memory_space<vmem>>, %arg6: memref<1x1xf32, #tpu.memory_space<smem>>, %arg7: memref<1x256x64xf32, #tpu.memory_space<vmem>>, %arg8: memref<1x256x256xbf16, #tpu.memory_space<vmem>>) attributes {dimension_semantics = [#tpu.dimension_semantics<parallel>, #tpu.dimension_semantics<parallel>], iteration_bounds = array<i64: 2, 1>, scalar_prefetch = 0 : i64, scratch_operands = 0 : i64, tpu.core_type = #tpu.core_type<tc>, window_params = [{transform_indices = @transform_0, window_bounds = array<i64: 1, 256, 128>}, {transform_indices = @transform_1, window_bounds = array<i64: 1, 256, 128>}, {transform_indices = @transform_2, window_bounds = array<i64: 1, 256, 64>}, {transform_indices = @transform_3, window_bounds = array<i64: 1, 256, 64>}, {transform_indices = @transform_4, window_bounds = array<i64: 1, 1>}, {transform_indices = @transform_5, window_bounds = array<i64: 1, 256, 64>}, {transform_indices = @transform_6, window_bounds = array<i64: 1, 256, 256>}]} {
    %c0 = arith.constant 0 : index
    %c0_0 = arith.constant 0 : index
    %c0_1 = arith.constant 0 : index
    %0 = vector.load %arg2[%c0, %c0_0, %c0_1] : memref<1x256x128xbf16, #tpu.memory_space<vmem>>, vector<1x256x128xbf16>
    %1 = vector.shape_cast %0 : vector<1x256x128xbf16> to vector<256x128xbf16>
    %c0_2 = arith.constant 0 : index
    %c0_3 = arith.constant 0 : index
    %c0_4 = arith.constant 0 : index
    %2 = vector.load %arg3[%c0_2, %c0_3, %c0_4] : memref<1x256x128xbf16, #tpu.memory_space<vmem>>, vector<1x256x128xbf16>
    %3 = vector.shape_cast %2 : vector<1x256x128xbf16> to vector<256x128xbf16>
    %cst = arith.constant dense<0.000000e+00> : vector<256x256xf32>
    %4 = tpu.matmul %1, %3, %cst {dimension_numbers = #tpu.dot_dimension_numbers<[1], [1], [0], [0], [0, 0, 1, 0], [], []>} : vector<256x128xbf16>, vector<256x128xbf16>, vector<256x256xf32> -> vector<256x256xf32>
    %cst_5 = arith.constant dense<0xFF800000> : vector<256xf32>
    %5 = vector.multi_reduction <maximumf>, %4, %cst_5 [1] : vector<256x256xf32> to vector<256xf32>
    %6 = vector.shape_cast %5 : vector<256xf32> to vector<256x1xf32>
    %7 = vector.broadcast %6 : vector<256x1xf32> to vector<256x256xf32>
    %8 = arith.subf %4, %7 : vector<256x256xf32>
    %9 = math.exp %8 : vector<256x256xf32>
    %cst_6 = arith.constant dense<0.000000e+00> : vector<256xf32>
    %10 = vector.multi_reduction <add>, %9, %cst_6 [1] : vector<256x256xf32> to vector<256xf32>
    %11 = vector.shape_cast %10 : vector<256xf32> to vector<256x1xf32>
    %12 = tpu.reciprocal %11 {approx = true} : vector<256x1xf32> -> vector<256x1xf32>
    %13 = vector.broadcast %12 : vector<256x1xf32> to vector<256x256xf32>
    %14 = arith.mulf %9, %13 : vector<256x256xf32>
    %15 = arith.truncf %14 : vector<256x256xf32> to vector<256x256xbf16>
    %c0_7 = arith.constant 0 : index
    %c0_8 = arith.constant 0 : index
    %c0_9 = arith.constant 0 : index
    %16 = vector.load %arg4[%c0_7, %c0_8, %c0_9] : memref<1x256x64xbf16, #tpu.memory_space<vmem>>, vector<1x256x64xbf16>
    %17 = vector.shape_cast %16 : vector<1x256x64xbf16> to vector<256x64xbf16>
    %cst_10 = arith.constant dense<0.000000e+00> : vector<256x64xf32>
    %18 = tpu.matmul %15, %17, %cst_10 {dimension_numbers = #tpu.dot_dimension_numbers<[1], [0], [0], [1], [0, 0, 1, 1], [], []>} : vector<256x256xbf16>, vector<256x64xbf16>, vector<256x64xf32> -> vector<256x64xf32>
    %c0_11 = arith.constant 0 : index
    %c0_12 = arith.constant 0 : index
    %19 = memref.load %arg6[%c0_11, %c0_12] : memref<1x1xf32, #tpu.memory_space<smem>>
    %20 = vector.broadcast %19 : f32 to vector<256x64xf32>
    %21 = arith.mulf %20, %18 : vector<256x64xf32>
    %c0_13 = arith.constant 0 : index
    %c0_14 = arith.constant 0 : index
    %c0_15 = arith.constant 0 : index
    %22 = vector.load %arg5[%c0_13, %c0_14, %c0_15] : memref<1x256x64xf32, #tpu.memory_space<vmem>>, vector<1x256x64xf32>
    %23 = vector.shape_cast %22 : vector<1x256x64xf32> to vector<256x64xf32>
    %24 = arith.addf %21, %23 : vector<256x64xf32>
    %c0_16 = arith.constant 0 : index
    %c0_17 = arith.constant 0 : index
    %c0_18 = arith.constant 0 : index
    %25 = vector.load %arg7[%c0_16, %c0_17, %c0_18] : memref<1x256x64xf32, #tpu.memory_space<vmem>>, vector<1x256x64xf32>
    %26 = vector.shape_cast %25 : vector<1x256x64xf32> to vector<256x64xf32>
    %27 = vector.shape_cast %24 : vector<256x64xf32> to vector<1x256x64xf32>
    tpu.vector_store %arg7[%c0_16, %c0_17, %c0_18], %27 {strides = array<i32>} : memref<1x256x64xf32, #tpu.memory_space<vmem>>, vector<1x256x64xf32>,
    %28 = arith.truncf %14 : vector<256x256xf32> to vector<256x256xbf16>
    %c0_19 = arith.constant 0 : index
    %c0_20 = arith.constant 0 : index
    %c0_21 = arith.constant 0 : index
    %29 = vector.load %arg8[%c0_19, %c0_20, %c0_21] : memref<1x256x256xbf16, #tpu.memory_space<vmem>>, vector<1x256x256xbf16>
    %30 = vector.shape_cast %29 : vector<1x256x256xbf16> to vector<256x256xbf16>
    %31 = vector.shape_cast %28 : vector<256x256xbf16> to vector<1x256x256xbf16>
    tpu.vector_store %arg8[%c0_19, %c0_20, %c0_21], %31 {strides = array<i32>} : memref<1x256x256xbf16, #tpu.memory_space<vmem>>, vector<1x256x256xbf16>,
    return
  }
  func.func @transform_0(%arg0: i32, %arg1: i32) -> (i32, i32, i32) {
    %c0_i32 = arith.constant 0 : i32
    %c0_i32_0 = arith.constant 0 : i32
    return %arg0, %arg1, %c0_i32 : i32, i32, i32
  }
  func.func @transform_1(%arg0: i32, %arg1: i32) -> (i32, i32, i32) {
    %c0_i32 = arith.constant 0 : i32
    %c0_i32_0 = arith.constant 0 : i32
    %c0_i32_1 = arith.constant 0 : i32
    return %arg0, %c0_i32, %c0_i32_0 : i32, i32, i32
  }
  func.func @transform_2(%arg0: i32, %arg1: i32) -> (i32, i32, i32) {
    %c0_i32 = arith.constant 0 : i32
    %c0_i32_0 = arith.constant 0 : i32
    %c0_i32_1 = arith.constant 0 : i32
    return %arg0, %c0_i32, %c0_i32_0 : i32, i32, i32
  }
  func.func @transform_3(%arg0: i32, %arg1: i32) -> (i32, i32, i32) {
    %c0_i32 = arith.constant 0 : i32
    %c0_i32_0 = arith.constant 0 : i32
    return %arg0, %arg1, %c0_i32 : i32, i32, i32
  }
  func.func @transform_4(%arg0: i32, %arg1: i32) -> (i32, i32) {
    %c0_i32 = arith.constant 0 : i32
    %c0_i32_0 = arith.constant 0 : i32
    %c0_i32_1 = arith.constant 0 : i32
    return %c0_i32, %c0_i32_0 : i32, i32
  }
  func.func @transform_5(%arg0: i32, %arg1: i32) -> (i32, i32, i32) {
    %c0_i32 = arith.constant 0 : i32
    %c0_i32_0 = arith.constant 0 : i32
    return %arg0, %arg1, %c0_i32 : i32, i32, i32
  }
  func.func @transform_6(%arg0: i32, %arg1: i32) -> (i32, i32, i32) {
    %c0_i32 = arith.constant 0 : i32
    %c0_i32_0 = arith.constant 0 : i32
    return %arg0, %arg1, %c0_i32 : i32, i32, i32
  }
}

</mosaic_0001>

<bundles_post_ra>
// kernel: mul.1
= control target key start
LH: loop header
LB: loop body
LE: loop exit
PB: predicated region body
PF: predicated region fallthrough
CT: control target
= control target key end

     0   :  { %v110_v12 = vmov 0.0   ;;  %s198_s0 = inlined_call_operand.vmem [shape: f32[8,64,1,1], index: 0, kind: input, shape index: {}]   ;;  %s199_s1 = inlined_call_operand.vmem [shape: f32[8,64,1,1], index: 1, kind: input, shape index: {}]   ;;  %s200_s2 = inlined_call_operand.vmem [shape: bf16[8,64,1,1], index: 2, kind: output, shape index: {}]  }
   0x1   :  { %v3_v0 = vld [vmem:[%s198_s0] sm:$0x1]  ;;  %v88_v2 = vld [vmem:[%s198_s0 + $0x1] sm:$0x1]  ;;  %v91_v5 = vld [vmem:[%s198_s0 + $0x2] sm:$0x1] }
   0x2   :  { %v4_v1 = vld [vmem:[%s199_s1] sm:$0x1]  ;;  %v89_v4 = vld [vmem:[%s199_s1 + $0x1] sm:$0x1]  ;;  %v92_v6 = vld [vmem:[%s199_s1 + $0x2] sm:$0x1] }
   0x3   :  { %v7_v3 = vmul.f32 %v4_v1, %v3_v0  ;;  %v17_v7 = vmul.f32 %v89_v4, %v88_v2  ;;  %v28_v8 = vmul.f32 %v92_v6, %v91_v5  ;;  %v94_v9 = vld [vmem:[%s198_s0 + $0x3] sm:$0x1]  ;;  %v97_v11 = vld [vmem:[%s198_s0 + $0x4] sm:$0x1]  ;;  %v100_v16 = vld [vmem:[%s198_s0 + $0x5] sm:$0x1] }
   0x4   :  { %v95_v10 = vld [vmem:[%s199_s1 + $0x3] sm:$0x1]  ;;  %v98_v15 = vld [vmem:[%s199_s1 + $0x4] sm:$0x1]  ;;  %v101_v17 = vld [vmem:[%s199_s1 + $0x5] sm:$0x1] }
   0x5   :  { %v9_v13 = vpack.c.bf16 %v110_v12, %v7_v3  ;;  %v39_v14 = vmul.f32 %v95_v10, %v94_v9  ;;  %v20_v18 = vpack.c.bf16 %v110_v12, %v17_v7  ;;  %v31_v19 = vpack.c.bf16 %v110_v12, %v28_v8  ;;  %v103_v22 = vld [vmem:[%s198_s0 + $0x6] sm:$0x1]  ;;  %v106_v24 = vld [vmem:[%s198_s0 + $0x7] sm:$0x1] }
   0x6   :  { %v50_v20 = vmul.f32 %v98_v15, %v97_v11  ;;  %v61_v21 = vmul.f32 %v101_v17, %v100_v16  ;;  %v104_v23 = vld [vmem:[%s199_s1 + $0x6] sm:$0x1]  ;;  %v107_v27 = vld [vmem:[%s199_s1 + $0x7] sm:$0x1] }
   0x7   :  { %10 = vst [vmem:[%s200_s2] sm:$0x1] %v9_v13  ;;  %v42_v25 = vpack.c.bf16 %v110_v12, %v39_v14  ;;  %v72_v26 = vmul.f32 %v104_v23, %v103_v22  ;;  %90 = vst [vmem:[%s200_s2 + $0x1] sm:$0x1] %v20_v18  ;;  %v83_v30 = vmul.f32 %v107_v27, %v106_v24 }
   0x8   :  { %93 = vst [vmem:[%s200_s2 + $0x2] sm:$0x1] %v31_v19  ;;  %v53_v28 = vpack.c.bf16 %v110_v12, %v50_v20  ;;  %v64_v29 = vpack.c.bf16 %v110_v12, %v61_v21 }
   0x9   :  { %96 = vst [vmem:[%s200_s2 + $0x3] sm:$0x1] %v42_v25  ;;  %v75_v31 = vpack.c.bf16 %v110_v12, %v72_v26  ;;  %v86_v32 = vpack.c.bf16 %v110_v12, %v83_v30 }
   0xa   :  { %99 = vst [vmem:[%s200_s2 + $0x4] sm:$0x1] %v53_v28  ;;  %102 = vst [vmem:[%s200_s2 + $0x5] sm:$0x1] %v64_v29 }
   0xb   :  { %105 = vst [vmem:[%s200_s2 + $0x6] sm:$0x1] %v75_v31  ;;  %108 = vst [vmem:[%s200_s2 + $0x7] sm:$0x1] %v86_v32 }

// kernel: self_attn_pallas.2
= control target key start
LH: loop header
LB: loop body
LE: loop exit
PB: predicated region body
PF: predicated region fallthrough
CT: control target
= control target key end

     0   :  { %s2233_s18 = smov 0   ;;  %s2235_s19 = smov 0   ;;  %s2601_s0 = inlined_call_operand.vmem [shape: bf16[2,256,64], index: 0, kind: input, shape index: {}]   ;;  %s2602_s1 = inlined_call_operand.vmem [shape: bf16[64,320], index: 1, kind: input, shape index: {}]   ;;  %s2603_s2 = inlined_call_operand.vmem [shape: f32[1,320], index: 2, kind: input, shape index: {}]   ;;  %s2604_s3 = inlined_call_operand.vmem [shape: bf16[2,256,128], index: 3, kind: output, shape index: {0}]   ;;  %s2605_s4 = inlined_call_operand.vmem [shape: bf16[2,256,128], index: 4, kind: output, shape index: {1}]   ;;  %s2606_s5 = inlined_call_operand.vmem [shape: bf16[2,256,64], index: 5, kind: output, shape index: {2}]  }
   0x1   :  { %s2237_s20 = smov 0  }
   0x2 LB: > { %s28_s21 = sadd.s32 1, %s2196_s19  ;;  %p1596_p0 = scmp.ge.s32.totalorder %s2200_s20, 1  ;;  %s2200_s20 = sphi %s2237_s20, %s16_s20   ;;  %s2196_s19 = sphi %s2235_s19, %s2608_s19   ;;  %s2192_s18 = sphi %s2233_s18, %s2607_s18  }
   0x3   : > { %p30_p1 = scmp.ge.s32.totalorder %s28_s21, 2  ;;  %p217_p2 = scmp.lt.s32.totalorder %s2200_s20, 3 }
   0x5   : > { %s2610_s21 = smov (%p30_p1, %s28_s21), 0  ;;  %p218_p3 = pnand %p1596_p0, %p217_p2 }
   0x6   : > { %v2146_v0 = vld [vmem:[%s2602_s1 + $0x4] ss:$12 sps:$4 sm:$0xff] (!%p218_p3)   ;;  %p272_p4 = scmp.lt.s32.totalorder (!%p218_p3), %s2192_s18, 1  ;;  %v2148_v1 = vld [vmem:[%s2602_s1] ss:$12 sps:$4 sm:$0xff] (!%p218_p3)   ;;  %v2202_v2 = vmov (!%p218_p3), 0   ;;  %v362_v29 = vlaneseq (!%p218_p3) }
   0x7   : > { %221 = sbr.rel (%p218_p3) target bundleno = 332 (0x14c), region = 32  ;;  %602 = vmatprep.mubr.bf16.mxu0 (!%p218_p3), %v2202_v2  ;;  %722 = vmatprep.mubr.bf16.mxu1 (!%p218_p3), %v2202_v2  ;;  %v2149_v3 = vld [vmem:[%s2602_s1 + $0x1c] ss:$12 sps:$4 sm:$0xff] (!%p218_p3)   ;;  %v2151_v4 = vld [vmem:[%s2602_s1 + $0x18] ss:$12 sps:$4 sm:$0xff] (!%p218_p3)   ;;  %vm521_vm0 = vcmask (!%p218_p3), 523264  }
   0x8   : > { %570 = vmatprep.subr.bf16.mxu0 (!%p218_p3), %v2146_v0  ;;  %2113 = vmatprep.subr.bf16.mxu1 (!%p218_p3), %v2146_v0  ;;  %v2152_v5 = vld [vmem:[%s2602_s1 + $0x34] ss:$12 sps:$4 sm:$0xff] (!%p218_p3)   ;;  %v2154_v6 = vld [vmem:[%s2602_s1 + $0x30] ss:$12 sps:$4 sm:$0xff] (!%p218_p3)   ;;  %v2155_v7 = vld [vmem:[%s2602_s1 + $0x4c] ss:$12 sps:$4 sm:$0xff] (!%p218_p3)  }
   0x9   : > { %571 = vmatpush1.bf16.msra.mxu0 (!%p218_p3), %v2148_v1  ;;  %2117 = vmatpush1.bf16.msra.mxu1 (!%p218_p3), %v2148_v1  ;;  %v2157_v8 = vld [vmem:[%s2602_s1 + $0x48] ss:$12 sps:$4 sm:$0xff] (!%p218_p3)   ;;  %v2163_v12 = vld [vmem:[%s2602_s1 + $0x20] ss:$12 sps:$4 sm:$0xff] (!%p218_p3)   ;;  %v2166_v13 = vld [vmem:[%s2602_s1 + $0x38] ss:$12 sps:$4 sm:$0xff] (!%p218_p3)  }
   0xa   : > { %572 = vmatprep.subr.bf16.mxu0 (!%p218_p3), %v2149_v3  ;;  %2114 = vmatprep.subr.bf16.mxu1 (!%p218_p3), %v2149_v3  ;;  %v2160_v9 = vld [vmem:[%s2602_s1 + $0x8] ss:$12 sps:$4 sm:$0xff] (!%p218_p3)   ;;  %v2169_v16 = vld [vmem:[%s2602_s1 + $0x50] ss:$12 sps:$4 sm:$0xff] (!%p218_p3)   ;;  %v2363_v30 = vshrl.u32 (!%p218_p3), %v362_v29, 7  ;;  %vm1372_vm1 = vcmask (!%p218_p3), 519168  }
   0xb   : > { %v2369_v32 = vld [vmem:[%s2603_s2] sm:$0x7] (!%p218_p3) }
   0xc   : > { %v364_v31 = vsub.s32 (!%p218_p3), 0, %v2363_v30  ;;  %v368_v33 = vsub.s32 (!%p218_p3), 1, %v2363_v30 }
   0xd   : > { %573 = vmatpush1.bf16.msra.mxu0 (!%p218_p3), %v2151_v4  ;;  %2118 = vmatpush1.bf16.msra.mxu1 (!%p218_p3), %v2151_v4 }
   0xe   : > { %s2612_s18 = smov (!%p272_p4, %s2192_s18), 1  ;;  %574 = vmatprep.subr.bf16.mxu0 %v2152_v5  ;;  %2115 = vmatprep.subr.bf16.mxu1 %v2152_v5  ;;  %v2373_v34 = vrot.slane %v2369_v32, %v364_v31  ;;  %v2376_v37 = vrot.slane %v2369_v32, %v368_v33 }
   0xf   : > { %s2268_s7 = sshll.u32 %s2612_s18, 7 }
  0x10   : > { %s2274_s10 = scalar_lea.vmem %s2601_s0, %s2268_s7  ;;  %s2388_s8 = scalar_lea.vmem %s2604_s3, %s2268_s7 }
  0x11   : > { %575 = vmatpush1.bf16.msra.mxu0 %v2154_v6  ;;  %2119 = vmatpush1.bf16.msra.mxu1 %v2154_v6  ;;  %v2158_v10 = vld [vmem:[%s2274_s10] sm:$0xff]   ;;  %v2161_v14 = vld [vmem:[%s2274_s10 + $0x8] sm:$0xff]   ;;  %v2164_v17 = vld [vmem:[%s2274_s10 + $0x10] sm:$0xff]   ;;  %s2396_s11 = scalar_lea.vmem %s2605_s4, %s2268_s7  ;;  %s2447_s14 = scalar_lea.vmem %s2606_s5, %s2268_s7 }
  0x12   : > { %576 = vmatprep.subr.bf16.mxu0 %v2155_v7  ;;  %2116 = vmatprep.subr.bf16.mxu1 %v2155_v7  ;;  %v2290_v11 = vld [vmem:[%s2274_s10 + $0x60] sm:$0xff]   ;;  %v2162_v15 = vld [vmem:[%s2274_s10 + $0x68] sm:$0xff]   ;;  %v2165_v18 = vld [vmem:[%s2274_s10 + $0x70] sm:$0xff]  }
  0x13   : > { %v2167_v19 = vld [vmem:[%s2274_s10 + $0x18] sm:$0xff]   ;;  %v2170_v21 = vld [vmem:[%s2274_s10 + $0x20] sm:$0xff]   ;;  %v2171_v22 = vld [vmem:[%s2274_s10 + $0x28] sm:$0xff]  }
  0x14   : > { %v2168_v20 = vld [vmem:[%s2274_s10 + $0x78] sm:$0xff]   ;;  %v2172_v23 = vld [vmem:[%s2274_s10 + $0x30] sm:$0xff]   ;;  %v2174_v25 = vld [vmem:[%s2274_s10 + $0x40] sm:$0xff]  }
  0x15   : > { %577 = vmatpush1.bf16.msra.mxu0 %v2157_v8  ;;  %2120 = vmatpush1.bf16.msra.mxu1 %v2157_v8  ;;  %v2173_v24 = vld [vmem:[%s2274_s10 + $0x38] sm:$0xff]   ;;  %v2175_v26 = vld [vmem:[%s2274_s10 + $0x48] sm:$0xff]   ;;  %v2176_v27 = vld [vmem:[%s2274_s10 + $0x50] sm:$0xff]  }
  0x16   : > { %2073 = vmatprep.subr.bf16.mxu1 %v2160_v9  ;;  %v2177_v28 = vld [vmem:[%s2274_s10 + $0x58] sm:$0xff]  }
  0x18   : > { %1633 = vmatmul.mubr.msk.bf16.vlgmr.msra.gmra.mrb[0].mxu0 %vm521_vm0, %v2158_v10  ;;  %1645 = vmatmul.mubr.msk.bf16.vlgmr.msra.gmra.mrb[0].mxu1 %vm521_vm0, %v2290_v11 }
  0x19   : > { %2074 = vmatpush3.bf16.msra.mxu1 %v2160_v9  ;;  %612 = vmatprep.mubr.bf16.mxu0 %v2202_v2 }
  0x1a   : > { %732 = vmatprep.mubr.bf16.mxu1 %v2202_v2  ;;  %2075 = vmatprep.subr.bf16.mxu1 %v2163_v12 }
  0x1d   : > { %2076 = vmatpush3.bf16.msra.mxu1 %v2163_v12 }
  0x1e   : > { %2077 = vmatprep.subr.bf16.mxu1 %v2166_v13 }
  0x20   : > { %1634 = vmatmul.mubr.msk.bf16.gmra.mrb[4].mxu0 %vm521_vm0, %v2161_v14  ;;  %1646 = vmatmul.mubr.msk.bf16.gmra.mrb[4].mxu1 %vm521_vm0, %v2162_v15 }
  0x21   : > { %622 = vmatprep.mubr.bf16.mxu0 %v2202_v2  ;;  %742 = vmatprep.mubr.bf16.mxu1 %v2202_v2 }
  0x22   : > { %2078 = vmatpush3.bf16.msra.mxu1 %v2166_v13 }
  0x23   : > { %2079 = vmatprep.subr.bf16.mxu1 %v2169_v16 }
  0x26   : > { %2080 = vmatpush3.bf16.msra.mxu1 %v2169_v16 }
  0x28   : > { %1635 = vmatmul.mubr.msk.bf16.gmra.mrb[8].mxu0 %vm521_vm0, %v2164_v17  ;;  %1647 = vmatmul.mubr.msk.bf16.gmra.mrb[8].mxu1 %vm521_vm0, %v2165_v18 }
  0x29   : > { %632 = vmatprep.mubr.bf16.mxu0 %v2202_v2  ;;  %752 = vmatprep.mubr.bf16.mxu1 %v2202_v2 }
  0x30   : > { %1636 = vmatmul.mubr.msk.bf16.gmra.mrb[12].mxu0 %vm521_vm0, %v2167_v19  ;;  %1648 = vmatmul.mubr.msk.bf16.gmra.mrb[12].mxu1 %vm521_vm0, %v2168_v20 }
  0x31   : > { %642 = vmatprep.mubr.bf16.mxu0 %v2202_v2  ;;  %2081 = vmatprep.mubr.msk.bf16.mxu1 %vm521_vm0, %v2158_v10 }
  0x38   : > { %1637 = vmatmul.mubr.msk.bf16.gmra.mrb[16].mxu0 %vm521_vm0, %v2170_v21  ;;  %2082 = vmatmul.mubr.msk.bf16.vlgmr.msra.gmra.mrb[16].mxu1 %vm521_vm0, %v2161_v14 }
  0x39   : > { %652 = vmatprep.mubr.bf16.mxu0 %v2202_v2  ;;  %2085 = vmatprep.mubr.msk.bf16.mxu1 %vm521_vm0, %v2164_v17 }
  0x40   : > { %1638 = vmatmul.mubr.msk.bf16.gmra.mrb[20].mxu0 %vm521_vm0, %v2171_v22  ;;  %2086 = vmatmul.mubr.msk.bf16.gmra.mrb[20].mxu1 %vm521_vm0, %v2167_v19 }
  0x41   : > { %662 = vmatprep.mubr.bf16.mxu0 %v2202_v2  ;;  %2089 = vmatprep.mubr.msk.bf16.mxu1 %vm521_vm0, %v2170_v21 }
  0x48   : > { %1639 = vmatmul.mubr.msk.bf16.gmra.mrb[24].mxu0 %vm521_vm0, %v2172_v23  ;;  %2090 = vmatmul.mubr.msk.bf16.gmra.mrb[24].mxu1 %vm521_vm0, %v2171_v22 }
  0x49   : > { %672 = vmatprep.mubr.bf16.mxu0 %v2202_v2  ;;  %2093 = vmatprep.mubr.msk.bf16.mxu1 %vm521_vm0, %v2172_v23 }
  0x50   : > { %1640 = vmatmul.mubr.msk.bf16.gmra.mrb[28].mxu0 %vm521_vm0, %v2173_v24  ;;  %2094 = vmatmul.mubr.msk.bf16.gmra.mrb[28].mxu1 %vm521_vm0, %v2173_v24 }
  0x51   : > { %682 = vmatprep.mubr.bf16.mxu0 %v2202_v2  ;;  %2097 = vmatprep.mubr.msk.bf16.mxu1 %vm521_vm0, %v2174_v25 }
  0x58   : > { %1641 = vmatmul.mubr.msk.bf16.gmra.mrb[32].mxu0 %vm521_vm0, %v2174_v25  ;;  %2098 = vmatmul.mubr.msk.bf16.gmra.mrb[32].mxu1 %vm521_vm0, %v2175_v26 }
  0x59   : > { %692 = vmatprep.mubr.bf16.mxu0 %v2202_v2  ;;  %2101 = vmatprep.mubr.msk.bf16.mxu1 %vm521_vm0, %v2176_v27 }
  0x60   : > { %1642 = vmatmul.mubr.msk.bf16.gmra.mrb[36].mxu0 %vm521_vm0, %v2175_v26  ;;  %2102 = vmatmul.mubr.msk.bf16.gmra.mrb[36].mxu1 %vm521_vm0, %v2177_v28 }
  0x61   : > { %702 = vmatprep.mubr.bf16.mxu0 %v2202_v2  ;;  %2105 = vmatprep.mubr.msk.bf16.mxu1 %vm521_vm0, %v2290_v11 }
  0x68   : > { %1643 = vmatmul.mubr.msk.bf16.gmra.mrb[40].mxu0 %vm521_vm0, %v2176_v27  ;;  %2106 = vmatmul.mubr.msk.bf16.gmra.mrb[40].mxu1 %vm521_vm0, %v2162_v15 }
  0x69   : > { %712 = vmatprep.mubr.bf16.mxu0 %v2202_v2  ;;  %2109 = vmatprep.mubr.msk.bf16.mxu1 %vm521_vm0, %v2165_v18 }
  0x70   : > { %1644 = vmatmul.mubr.msk.bf16.gmra.mrb[44].mxu0 %vm521_vm0, %v2177_v28  ;;  %2110 = vmatmul.mubr.msk.bf16.gmra.mrb[44].mxu1 %vm521_vm0, %v2168_v20 }
  0xeb   : > { %v604_v35 = vpop.f32.mrb[0].mxu0  ;;  %v724_v36 = vpop.f32.mrb[0].mxu1 }
  0xec   : > { %v606_v38 = vpop.f32.mrb[1].mxu0  ;;  %v726_v39 = vpop.f32.mrb[1].mxu1  ;;  %v605_v42 = vadd.f32 %v604_v35, %v2373_v34  ;;  %v725_v43 = vadd.f32 %v724_v36, %v2373_v34 }
  0xed   : > { %v608_v40 = vpop.f32.mrb[2].mxu0  ;;  %v728_v41 = vpop.f32.mrb[2].mxu1  ;;  %v607_v48 = vadd.f32 %v606_v38, %v2376_v37  ;;  %v727_v49 = vadd.f32 %v726_v39, %v2376_v37 }
  0xee   : > { %v609_v44 = vadd.f32 %v608_v40, %v2373_v34  ;;  %v729_v45 = vadd.f32 %v728_v41, %v2373_v34  ;;  %v610_v46 = vpop.f32.mrb[3].mxu0  ;;  %v730_v47 = vpop.f32.mrb[3].mxu1  ;;  %v372_v40 = vsub.s32 2, %v2363_v30 }
  0xef   : > { %v611_v50 = vadd.f32 %v610_v46, %v2376_v37  ;;  %v731_v51 = vadd.f32 %v730_v47, %v2376_v37 }
  0xf0   : > { %v1866_v52 = vpack.c.bf16 %v609_v44, %v605_v42  ;;  %v1926_v53 = vpack.c.bf16 %v729_v45, %v725_v43 }
  0xf1   : > { %v1946_v54 = vpack.c.bf16 %v611_v50, %v607_v48  ;;  %v2006_v55 = vpack.c.bf16 %v731_v51, %v727_v49 }
  0xf2   : > { %1867 = vst [vmem:[%s2388_s8] sm:$0xff] %v1866_v52   ;;  %2034 = vst [vmem:[%s2388_s8 + $0x60] sm:$0xff] %v1926_v53  }
  0xf3   : > { %1947 = vst [vmem:[%s2396_s11] sm:$0xff] %v1946_v54   ;;  %2049 = vst [vmem:[%s2396_s11 + $0x60] sm:$0xff] %v2006_v55   ;;  %v614_v56 = vpop.f32.mrb[4].mxu0  ;;  %v734_v57 = vpop.f32.mrb[4].mxu1  ;;  %v2436_v54 = vrot.slane %v2369_v32, %v372_v40 }
  0xf4   : > { %v616_v58 = vpop.f32.mrb[5].mxu0  ;;  %v736_v59 = vpop.f32.mrb[5].mxu1  ;;  %v615_v62 = vadd.f32 %v614_v56, %v2373_v34  ;;  %v735_v63 = vadd.f32 %v734_v57, %v2373_v34 }
  0xf5   : > { %v618_v60 = vpop.f32.mrb[6].mxu0  ;;  %v738_v61 = vpop.f32.mrb[6].mxu1  ;;  %v617_v4 = vadd.f32 %v616_v58, %v2376_v37  ;;  %v737_v5 = vadd.f32 %v736_v59, %v2376_v37 }
  0xf6   : > { %v619_v0 = vadd.f32 %v618_v60, %v2373_v34  ;;  %v739_v1 = vadd.f32 %v738_v61, %v2373_v34  ;;  %v620_v2 = vpop.f32.mrb[7].mxu0  ;;  %v740_v3 = vpop.f32.mrb[7].mxu1 }
  0xf7   : > { %v621_v6 = vadd.f32 %v620_v2, %v2376_v37  ;;  %v741_v7 = vadd.f32 %v740_v3, %v2376_v37 }
  0xf8   : > { %v1871_v8 = vpack.c.bf16 %v619_v0, %v615_v62  ;;  %v1931_v9 = vpack.c.bf16 %v739_v1, %v735_v63 }
  0xf9   : > { %v1951_v10 = vpack.c.bf16 %v621_v6, %v617_v4  ;;  %v2011_v11 = vpack.c.bf16 %v741_v7, %v737_v5 }
  0xfa   : > { %2023 = vst [vmem:[%s2388_s8 + $0x8] sm:$0xff] %v1871_v8   ;;  %2035 = vst [vmem:[%s2388_s8 + $0x68] sm:$0xff] %v1931_v9  }
  0xfb   : > { %2038 = vst [vmem:[%s2396_s11 + $0x8] sm:$0xff] %v1951_v10   ;;  %2050 = vst [vmem:[%s2396_s11 + $0x68] sm:$0xff] %v2011_v11   ;;  %v624_v12 = vpop.f32.mrb[8].mxu0  ;;  %v744_v13 = vpop.f32.mrb[8].mxu1 }
  0xfc   : > { %v626_v14 = vpop.f32.mrb[9].mxu0  ;;  %v746_v15 = vpop.f32.mrb[9].mxu1  ;;  %v625_v18 = vadd.f32 %v624_v12, %v2373_v34  ;;  %v745_v19 = vadd.f32 %v744_v13, %v2373_v34 }
  0xfd   : > { %v628_v16 = vpop.f32.mrb[10].mxu0  ;;  %v748_v17 = vpop.f32.mrb[10].mxu1  ;;  %v627_v24 = vadd.f32 %v626_v14, %v2376_v37  ;;  %v747_v25 = vadd.f32 %v746_v15, %v2376_v37 }
  0xfe   : > { %v629_v20 = vadd.f32 %v628_v16, %v2373_v34  ;;  %v749_v21 = vadd.f32 %v748_v17, %v2373_v34  ;;  %v630_v22 = vpop.f32.mrb[11].mxu0  ;;  %v750_v23 = vpop.f32.mrb[11].mxu1 }
  0xff   : > { %v631_v26 = vadd.f32 %v630_v22, %v2376_v37  ;;  %v751_v27 = vadd.f32 %v750_v23, %v2376_v37 }
 0x100   : > { %v1876_v28 = vpack.c.bf16 %v629_v20, %v625_v18  ;;  %v1936_v29 = vpack.c.bf16 %v749_v21, %v745_v19 }
 0x101   : > { %v1956_v31 = vpack.c.bf16 %v631_v26, %v627_v24  ;;  %v2016_v33 = vpack.c.bf16 %v751_v27, %v747_v25 }
 0x102   : > { %2024 = vst [vmem:[%s2388_s8 + $0x10] sm:$0xff] %v1876_v28   ;;  %2036 = vst [vmem:[%s2388_s8 + $0x70] sm:$0xff] %v1936_v29  }
 0x103   : > { %2039 = vst [vmem:[%s2396_s11 + $0x10] sm:$0xff] %v1956_v31   ;;  %2051 = vst [vmem:[%s2396_s11 + $0x70] sm:$0xff] %v2016_v33   ;;  %v634_v35 = vpop.f32.mrb[12].mxu0  ;;  %v754_v36 = vpop.f32.mrb[12].mxu1 }
 0x104   : > { %v636_v38 = vpop.f32.mrb[13].mxu0  ;;  %v756_v39 = vpop.f32.mrb[13].mxu1  ;;  %v635_v43 = vadd.f32 %v634_v35, %v2373_v34  ;;  %v755_v44 = vadd.f32 %v754_v36, %v2373_v34 }
 0x105   : > { %v638_v41 = vpop.f32.mrb[14].mxu0  ;;  %v758_v42 = vpop.f32.mrb[14].mxu1  ;;  %v637_v49 = vadd.f32 %v636_v38, %v2376_v37  ;;  %v757_v30 = vadd.f32 %v756_v39, %v2376_v37 }
 0x106   : > { %v639_v45 = vadd.f32 %v638_v41, %v2373_v34  ;;  %v759_v46 = vadd.f32 %v758_v42, %v2373_v34  ;;  %v640_v47 = vpop.f32.mrb[15].mxu0  ;;  %v760_v48 = vpop.f32.mrb[15].mxu1 }
 0x107   : > { %v641_v50 = vadd.f32 %v640_v47, %v2376_v37  ;;  %v761_v51 = vadd.f32 %v760_v48, %v2376_v37 }
 0x108   : > { %v1881_v52 = vpack.c.bf16 %v639_v45, %v635_v43  ;;  %v1941_v53 = vpack.c.bf16 %v759_v46, %v755_v44 }
 0x109   : > { %v1961_v55 = vpack.c.bf16 %v641_v50, %v637_v49  ;;  %v2021_v56 = vpack.c.bf16 %v761_v51, %v757_v30 }
 0x10a   : > { %2025 = vst [vmem:[%s2388_s8 + $0x18] sm:$0xff] %v1881_v52   ;;  %2037 = vst [vmem:[%s2388_s8 + $0x78] sm:$0xff] %v1941_v53  }
 0x10b   : > { %2040 = vst [vmem:[%s2396_s11 + $0x18] sm:$0xff] %v1961_v55   ;;  %2052 = vst [vmem:[%s2396_s11 + $0x78] sm:$0xff] %v2021_v56   ;;  %v644_v57 = vpop.f32.mrb[16].mxu0  ;;  %v2083_v58 = vpop.f32.mrb[16].mxu1 }
 0x10c   : > { %v806_v59 = vadd.f32 %v2083_v58, %v2436_v54  ;;  %v646_v60 = vpop.f32.mrb[17].mxu0  ;;  %v797_v61 = vpop.f32.mrb[17].mxu1  ;;  %v645_v0 = vadd.f32 %v644_v57, %v2373_v34 }
 0x10d   : > { %v798_v32 = vadd.f32 %v797_v61, %v2436_v54  ;;  %v648_v62 = vpop.f32.mrb[18].mxu0  ;;  %v2084_v63 = vpop.f32.mrb[18].mxu1  ;;  %v647_v6 = vadd.f32 %v646_v60, %v2376_v37 }
 0x10e   : > { %v1833_v1 = vpack.c.bf16 %v806_v59, %v806_v59  ;;  %v649_v2 = vadd.f32 %v648_v62, %v2373_v34  ;;  %v809_v3 = vadd.f32 %v2084_v63, %v2436_v54  ;;  %v650_v4 = vpop.f32.mrb[19].mxu0  ;;  %v800_v5 = vpop.f32.mrb[19].mxu1 }
 0x10f   : > { %v1831_v7 = vpack.c.bf16 %v798_v32, %v798_v32  ;;  %v651_v8 = vadd.f32 %v650_v4, %v2376_v37  ;;  %v801_v9 = vadd.f32 %v800_v5, %v2436_v54 }
 0x110   : > { %1375 = vst.msk [vmem:[%s2447_s14 + $0x8] sm:$0xf] %vm1372_vm1, %v1833_v1  ;;  %v1886_v10 = vpack.c.bf16 %v649_v2, %v645_v0  ;;  %v1834_v11 = vpack.c.bf16 %v809_v3, %v809_v3 }
 0x111   : > { %1373 = vst.msk [vmem:[%s2447_s14] sm:$0xf] %vm1372_vm1, %v1831_v7  ;;  %v1966_v12 = vpack.c.bf16 %v651_v8, %v647_v6  ;;  %v1832_v13 = vpack.c.bf16 %v801_v9, %v801_v9 }
 0x112   : > { %2026 = vst [vmem:[%s2388_s8 + $0x20] sm:$0xff] %v1886_v10   ;;  %1376 = vst.msk [vmem:[%s2447_s14 + $0xc] sm:$0xf] %vm1372_vm1, %v1834_v11 }
 0x113   : > { %2041 = vst [vmem:[%s2396_s11 + $0x20] sm:$0xff] %v1966_v12   ;;  %1374 = vst.msk [vmem:[%s2447_s14 + $0x4] sm:$0xf] %vm1372_vm1, %v1832_v13  ;;  %v654_v14 = vpop.f32.mrb[20].mxu0  ;;  %v2087_v15 = vpop.f32.mrb[20].mxu1 }
 0x114   : > { %v822_v16 = vadd.f32 %v2087_v15, %v2436_v54  ;;  %v656_v17 = vpop.f32.mrb[21].mxu0  ;;  %v813_v18 = vpop.f32.mrb[21].mxu1  ;;  %v655_v22 = vadd.f32 %v654_v14, %v2373_v34 }
 0x115   : > { %v814_v19 = vadd.f32 %v813_v18, %v2436_v54  ;;  %v658_v20 = vpop.f32.mrb[22].mxu0  ;;  %v2088_v21 = vpop.f32.mrb[22].mxu1  ;;  %v657_v28 = vadd.f32 %v656_v17, %v2376_v37 }
 0x116   : > { %v1837_v23 = vpack.c.bf16 %v822_v16, %v822_v16  ;;  %v659_v24 = vadd.f32 %v658_v20, %v2373_v34  ;;  %v825_v25 = vadd.f32 %v2088_v21, %v2436_v54  ;;  %v660_v26 = vpop.f32.mrb[23].mxu0  ;;  %v816_v27 = vpop.f32.mrb[23].mxu1 }
 0x117   : > { %v1835_v29 = vpack.c.bf16 %v814_v19, %v814_v19  ;;  %v661_v31 = vadd.f32 %v660_v26, %v2376_v37  ;;  %v817_v33 = vadd.f32 %v816_v27, %v2436_v54 }
 0x118   : > { %1379 = vst.msk [vmem:[%s2447_s14 + $0x18] sm:$0xf] %vm1372_vm1, %v1837_v23  ;;  %v1891_v35 = vpack.c.bf16 %v659_v24, %v655_v22  ;;  %v1838_v36 = vpack.c.bf16 %v825_v25, %v825_v25 }
 0x119   : > { %1377 = vst.msk [vmem:[%s2447_s14 + $0x10] sm:$0xf] %vm1372_vm1, %v1835_v29  ;;  %v1971_v38 = vpack.c.bf16 %v661_v31, %v657_v28  ;;  %v1836_v39 = vpack.c.bf16 %v817_v33, %v817_v33 }
 0x11a   : > { %2027 = vst [vmem:[%s2388_s8 + $0x28] sm:$0xff] %v1891_v35   ;;  %1380 = vst.msk [vmem:[%s2447_s14 + $0x1c] sm:$0xf] %vm1372_vm1, %v1838_v36 }
 0x11b   : > { %2042 = vst [vmem:[%s2396_s11 + $0x28] sm:$0xff] %v1971_v38   ;;  %1378 = vst.msk [vmem:[%s2447_s14 + $0x14] sm:$0xf] %vm1372_vm1, %v1836_v39  ;;  %v664_v40 = vpop.f32.mrb[24].mxu0  ;;  %v2091_v41 = vpop.f32.mrb[24].mxu1 }
 0x11c   : > { %v838_v42 = vadd.f32 %v2091_v41, %v2436_v54  ;;  %v666_v43 = vpop.f32.mrb[25].mxu0  ;;  %v829_v44 = vpop.f32.mrb[25].mxu1  ;;  %v665_v48 = vadd.f32 %v664_v40, %v2373_v34 }
 0x11d   : > { %v830_v45 = vadd.f32 %v829_v44, %v2436_v54  ;;  %v668_v46 = vpop.f32.mrb[26].mxu0  ;;  %v2092_v47 = vpop.f32.mrb[26].mxu1  ;;  %v667_v53 = vadd.f32 %v666_v43, %v2376_v37 }
 0x11e   : > { %v1841_v49 = vpack.c.bf16 %v838_v42, %v838_v42  ;;  %v669_v30 = vadd.f32 %v668_v46, %v2373_v34  ;;  %v841_v50 = vadd.f32 %v2092_v47, %v2436_v54  ;;  %v670_v51 = vpop.f32.mrb[27].mxu0  ;;  %v832_v52 = vpop.f32.mrb[27].mxu1 }
 0x11f   : > { %v1839_v55 = vpack.c.bf16 %v830_v45, %v830_v45  ;;  %v671_v56 = vadd.f32 %v670_v51, %v2376_v37  ;;  %v833_v57 = vadd.f32 %v832_v52, %v2436_v54 }
 0x120   : > { %1383 = vst.msk [vmem:[%s2447_s14 + $0x28] sm:$0xf] %vm1372_vm1, %v1841_v49  ;;  %v1896_v58 = vpack.c.bf16 %v669_v30, %v665_v48  ;;  %v1842_v59 = vpack.c.bf16 %v841_v50, %v841_v50 }
 0x121   : > { %1381 = vst.msk [vmem:[%s2447_s14 + $0x20] sm:$0xf] %vm1372_vm1, %v1839_v55  ;;  %v1976_v60 = vpack.c.bf16 %v671_v56, %v667_v53  ;;  %v1840_v61 = vpack.c.bf16 %v833_v57, %v833_v57 }
 0x122   : > { %2028 = vst [vmem:[%s2388_s8 + $0x30] sm:$0xff] %v1896_v58   ;;  %1384 = vst.msk [vmem:[%s2447_s14 + $0x2c] sm:$0xf] %vm1372_vm1, %v1842_v59 }
 0x123   : > { %2043 = vst [vmem:[%s2396_s11 + $0x30] sm:$0xff] %v1976_v60   ;;  %1382 = vst.msk [vmem:[%s2447_s14 + $0x24] sm:$0xf] %vm1372_vm1, %v1840_v61  ;;  %v674_v32 = vpop.f32.mrb[28].mxu0  ;;  %v2095_v62 = vpop.f32.mrb[28].mxu1 }
 0x124   : > { %v854_v63 = vadd.f32 %v2095_v62, %v2436_v54  ;;  %v676_v0 = vpop.f32.mrb[29].mxu0  ;;  %v845_v1 = vpop.f32.mrb[29].mxu1  ;;  %v675_v5 = vadd.f32 %v674_v32, %v2373_v34 }
 0x125   : > { %v846_v2 = vadd.f32 %v845_v1, %v2436_v54  ;;  %v678_v3 = vpop.f32.mrb[30].mxu0  ;;  %v2096_v4 = vpop.f32.mrb[30].mxu1  ;;  %v677_v11 = vadd.f32 %v676_v0, %v2376_v37 }
 0x126   : > { %v1845_v6 = vpack.c.bf16 %v854_v63, %v854_v63  ;;  %v679_v7 = vadd.f32 %v678_v3, %v2373_v34  ;;  %v857_v8 = vadd.f32 %v2096_v4, %v2436_v54  ;;  %v680_v9 = vpop.f32.mrb[31].mxu0  ;;  %v848_v10 = vpop.f32.mrb[31].mxu1 }
 0x127   : > { %v1843_v12 = vpack.c.bf16 %v846_v2, %v846_v2  ;;  %v681_v13 = vadd.f32 %v680_v9, %v2376_v37  ;;  %v849_v14 = vadd.f32 %v848_v10, %v2436_v54 }
 0x128   : > { %1387 = vst.msk [vmem:[%s2447_s14 + $0x38] sm:$0xf] %vm1372_vm1, %v1845_v6  ;;  %v1901_v15 = vpack.c.bf16 %v679_v7, %v675_v5  ;;  %v1846_v16 = vpack.c.bf16 %v857_v8, %v857_v8 }
 0x129   : > { %1385 = vst.msk [vmem:[%s2447_s14 + $0x30] sm:$0xf] %vm1372_vm1, %v1843_v12  ;;  %v1981_v17 = vpack.c.bf16 %v681_v13, %v677_v11  ;;  %v1844_v18 = vpack.c.bf16 %v849_v14, %v849_v14 }
 0x12a   : > { %2029 = vst [vmem:[%s2388_s8 + $0x38] sm:$0xff] %v1901_v15   ;;  %1388 = vst.msk [vmem:[%s2447_s14 + $0x3c] sm:$0xf] %vm1372_vm1, %v1846_v16 }
 0x12b   : > { %2044 = vst [vmem:[%s2396_s11 + $0x38] sm:$0xff] %v1981_v17   ;;  %1386 = vst.msk [vmem:[%s2447_s14 + $0x34] sm:$0xf] %vm1372_vm1, %v1844_v18  ;;  %v684_v19 = vpop.f32.mrb[32].mxu0  ;;  %v2099_v20 = vpop.f32.mrb[32].mxu1 }
 0x12c   : > { %v870_v21 = vadd.f32 %v2099_v20, %v2436_v54  ;;  %v686_v22 = vpop.f32.mrb[33].mxu0  ;;  %v861_v23 = vpop.f32.mrb[33].mxu1  ;;  %v685_v27 = vadd.f32 %v684_v19, %v2373_v34 }
 0x12d   : > { %v862_v24 = vadd.f32 %v861_v23, %v2436_v54  ;;  %v688_v25 = vpop.f32.mrb[34].mxu0  ;;  %v2100_v26 = vpop.f32.mrb[34].mxu1  ;;  %v687_v36 = vadd.f32 %v686_v22, %v2376_v37 }
 0x12e   : > { %v1849_v28 = vpack.c.bf16 %v870_v21, %v870_v21  ;;  %v689_v29 = vadd.f32 %v688_v25, %v2373_v34  ;;  %v873_v31 = vadd.f32 %v2100_v26, %v2436_v54  ;;  %v690_v33 = vpop.f32.mrb[35].mxu0  ;;  %v864_v35 = vpop.f32.mrb[35].mxu1 }
 0x12f   : > { %v1847_v38 = vpack.c.bf16 %v862_v24, %v862_v24  ;;  %v691_v39 = vadd.f32 %v690_v33, %v2376_v37  ;;  %v865_v40 = vadd.f32 %v864_v35, %v2436_v54 }
 0x130   : > { %1391 = vst.msk [vmem:[%s2447_s14 + $0x48] sm:$0xf] %vm1372_vm1, %v1849_v28  ;;  %v1906_v41 = vpack.c.bf16 %v689_v29, %v685_v27  ;;  %v1850_v42 = vpack.c.bf16 %v873_v31, %v873_v31 }
 0x131   : > { %1389 = vst.msk [vmem:[%s2447_s14 + $0x40] sm:$0xf] %vm1372_vm1, %v1847_v38  ;;  %v1986_v43 = vpack.c.bf16 %v691_v39, %v687_v36  ;;  %v1848_v44 = vpack.c.bf16 %v865_v40, %v865_v40 }
 0x132   : > { %2030 = vst [vmem:[%s2388_s8 + $0x40] sm:$0xff] %v1906_v41   ;;  %1392 = vst.msk [vmem:[%s2447_s14 + $0x4c] sm:$0xf] %vm1372_vm1, %v1850_v42 }
 0x133   : > { %2045 = vst [vmem:[%s2396_s11 + $0x40] sm:$0xff] %v1986_v43   ;;  %1390 = vst.msk [vmem:[%s2447_s14 + $0x44] sm:$0xf] %vm1372_vm1, %v1848_v44  ;;  %v694_v45 = vpop.f32.mrb[36].mxu0  ;;  %v2103_v46 = vpop.f32.mrb[36].mxu1 }
 0x134   : > { %v886_v47 = vadd.f32 %v2103_v46, %v2436_v54  ;;  %v696_v48 = vpop.f32.mrb[37].mxu0  ;;  %v877_v49 = vpop.f32.mrb[37].mxu1  ;;  %v695_v52 = vadd.f32 %v694_v45, %v2373_v34 }
 0x135   : > { %v878_v30 = vadd.f32 %v877_v49, %v2436_v54  ;;  %v698_v50 = vpop.f32.mrb[38].mxu0  ;;  %v2104_v51 = vpop.f32.mrb[38].mxu1  ;;  %v697_v59 = vadd.f32 %v696_v48, %v2376_v37 }
 0x136   : > { %v1853_v53 = vpack.c.bf16 %v886_v47, %v886_v47  ;;  %v699_v55 = vadd.f32 %v698_v50, %v2373_v34  ;;  %v889_v56 = vadd.f32 %v2104_v51, %v2436_v54  ;;  %v700_v57 = vpop.f32.mrb[39].mxu0  ;;  %v880_v58 = vpop.f32.mrb[39].mxu1 }
 0x137   : > { %v1851_v60 = vpack.c.bf16 %v878_v30, %v878_v30  ;;  %v701_v61 = vadd.f32 %v700_v57, %v2376_v37  ;;  %v881_v32 = vadd.f32 %v880_v58, %v2436_v54 }
 0x138   : > { %1395 = vst.msk [vmem:[%s2447_s14 + $0x58] sm:$0xf] %vm1372_vm1, %v1853_v53  ;;  %v1911_v62 = vpack.c.bf16 %v699_v55, %v695_v52  ;;  %v1854_v63 = vpack.c.bf16 %v889_v56, %v889_v56 }
 0x139   : > { %1393 = vst.msk [vmem:[%s2447_s14 + $0x50] sm:$0xf] %vm1372_vm1, %v1851_v60  ;;  %v1991_v0 = vpack.c.bf16 %v701_v61, %v697_v59  ;;  %v1852_v1 = vpack.c.bf16 %v881_v32, %v881_v32 }
 0x13a   : > { %2031 = vst [vmem:[%s2388_s8 + $0x48] sm:$0xff] %v1911_v62   ;;  %1396 = vst.msk [vmem:[%s2447_s14 + $0x5c] sm:$0xf] %vm1372_vm1, %v1854_v63 }
 0x13b   : > { %2046 = vst [vmem:[%s2396_s11 + $0x48] sm:$0xff] %v1991_v0   ;;  %1394 = vst.msk [vmem:[%s2447_s14 + $0x54] sm:$0xf] %vm1372_vm1, %v1852_v1  ;;  %v704_v2 = vpop.f32.mrb[40].mxu0  ;;  %v2107_v3 = vpop.f32.mrb[40].mxu1 }
 0x13c   : > { %v902_v4 = vadd.f32 %v2107_v3, %v2436_v54  ;;  %v706_v5 = vpop.f32.mrb[41].mxu0  ;;  %v893_v6 = vpop.f32.mrb[41].mxu1  ;;  %v705_v10 = vadd.f32 %v704_v2, %v2373_v34 }
 0x13d   : > { %v894_v7 = vadd.f32 %v893_v6, %v2436_v54  ;;  %v708_v8 = vpop.f32.mrb[42].mxu0  ;;  %v2108_v9 = vpop.f32.mrb[42].mxu1  ;;  %v707_v16 = vadd.f32 %v706_v5, %v2376_v37 }
 0x13e   : > { %v1857_v11 = vpack.c.bf16 %v902_v4, %v902_v4  ;;  %v709_v12 = vadd.f32 %v708_v8, %v2373_v34  ;;  %v905_v13 = vadd.f32 %v2108_v9, %v2436_v54  ;;  %v710_v14 = vpop.f32.mrb[43].mxu0  ;;  %v896_v15 = vpop.f32.mrb[43].mxu1 }
 0x13f   : > { %v1855_v17 = vpack.c.bf16 %v894_v7, %v894_v7  ;;  %v711_v18 = vadd.f32 %v710_v14, %v2376_v37  ;;  %v897_v19 = vadd.f32 %v896_v15, %v2436_v54 }
 0x140   : > { %1399 = vst.msk [vmem:[%s2447_s14 + $0x68] sm:$0xf] %vm1372_vm1, %v1857_v11  ;;  %v1916_v20 = vpack.c.bf16 %v709_v12, %v705_v10  ;;  %v1858_v21 = vpack.c.bf16 %v905_v13, %v905_v13 }
 0x141   : > { %1397 = vst.msk [vmem:[%s2447_s14 + $0x60] sm:$0xf] %vm1372_vm1, %v1855_v17  ;;  %v1996_v22 = vpack.c.bf16 %v711_v18, %v707_v16  ;;  %v1856_v23 = vpack.c.bf16 %v897_v19, %v897_v19 }
 0x142   : > { %2032 = vst [vmem:[%s2388_s8 + $0x50] sm:$0xff] %v1916_v20   ;;  %1400 = vst.msk [vmem:[%s2447_s14 + $0x6c] sm:$0xf] %vm1372_vm1, %v1858_v21 }
 0x143   : > { %2047 = vst [vmem:[%s2396_s11 + $0x50] sm:$0xff] %v1996_v22   ;;  %1398 = vst.msk [vmem:[%s2447_s14 + $0x64] sm:$0xf] %vm1372_vm1, %v1856_v23  ;;  %v714_v24 = vpop.f32.mrb[44].mxu0  ;;  %v2111_v25 = vpop.f32.mrb[44].mxu1 }
 0x144   : > { %v918_v26 = vadd.f32 %v2111_v25, %v2436_v54  ;;  %v716_v27 = vpop.f32.mrb[45].mxu0  ;;  %v909_v28 = vpop.f32.mrb[45].mxu1  ;;  %v715_v35 = vadd.f32 %v714_v24, %v2373_v34 }
 0x145   : > { %v910_v29 = vadd.f32 %v909_v28, %v2436_v54  ;;  %v718_v31 = vpop.f32.mrb[46].mxu0  ;;  %v2112_v33 = vpop.f32.mrb[46].mxu1  ;;  %v717_v42 = vadd.f32 %v716_v27, %v2376_v37 }
 0x146   : > { %v1861_v36 = vpack.c.bf16 %v918_v26, %v918_v26  ;;  %v719_v38 = vadd.f32 %v718_v31, %v2373_v34  ;;  %v921_v39 = vadd.f32 %v2112_v33, %v2436_v54  ;;  %v720_v40 = vpop.f32.mrb[47].mxu0  ;;  %v912_v41 = vpop.f32.mrb[47].mxu1 }
 0x147   : > { %v1859_v43 = vpack.c.bf16 %v910_v29, %v910_v29  ;;  %v721_v44 = vadd.f32 %v720_v40, %v2376_v37  ;;  %v913_v45 = vadd.f32 %v912_v41, %v2436_v54 }
 0x148   : > { %1403 = vst.msk [vmem:[%s2447_s14 + $0x78] sm:$0xf] %vm1372_vm1, %v1861_v36  ;;  %v1921_v46 = vpack.c.bf16 %v719_v38, %v715_v35  ;;  %v1862_v47 = vpack.c.bf16 %v921_v39, %v921_v39 }
 0x149   : > { %1401 = vst.msk [vmem:[%s2447_s14 + $0x70] sm:$0xf] %vm1372_vm1, %v1859_v43  ;;  %v2001_v34 = vpack.c.bf16 %v721_v44, %v717_v42  ;;  %v1860_v48 = vpack.c.bf16 %v913_v45, %v913_v45 }
 0x14a   : > { %2033 = vst [vmem:[%s2388_s8 + $0x58] sm:$0xff] %v1921_v46   ;;  %1404 = vst.msk [vmem:[%s2447_s14 + $0x7c] sm:$0xf] %vm1372_vm1, %v1862_v47 }
 0x14b   : > { %2048 = vst [vmem:[%s2396_s11 + $0x58] sm:$0xff] %v2001_v34   ;;  %1402 = vst.msk [vmem:[%s2447_s14 + $0x74] sm:$0xf] %vm1372_vm1, %v1860_v48 }
 0x14c PF: > { %s16_s20 = sadd.s32 1, %s2200_s20   ;;  %s2607_s18 = smov %s2196_s19 }
 0x14d   : > { %p13_p5 = scmp.ge.s32.totalorder %s16_s20, 4   ;;  %s2608_s19 = smov %s2610_s21 }
 0x14f   :  { %15 = sbr.rel (!%p13_p5) target bundleno = 2 (0x2), region = 86 }

// kernel: self_attn_pallas.3
= control target key start
LH: loop header
LB: loop body
LE: loop exit
PB: predicated region body
PF: predicated region fallthrough
CT: control target
= control target key end

     0   :  { %s3840_s0 = inlined_call_operand.vmem [shape: bf16[2,256,128], index: 0, kind: input, shape index: {}]   ;;  %s3841_s1 = inlined_call_operand.vmem [shape: bf16[2,256,128], index: 1, kind: input, shape index: {}]   ;;  %s3842_s2 = inlined_call_operand.vmem [shape: bf16[2,256,64], index: 2, kind: input, shape index: {}]   ;;  %s3843_s3 = inlined_call_operand.vmem [shape: f32[2,256,64], index: 3, kind: input, shape index: {}]   ;;  %s3844_s4 = inlined_call_operand.<no memory space> [shape: f32[1,1], index: 4, kind: input, shape index: {}]   ;;  %s3845_s5 = inlined_call_operand.hbm [shape: f32[2,256,64], index: 5, kind: output, shape index: {0}]   ;;  %s3846_s6 = inlined_call_operand.hbm [shape: bf16[2,256,256], index: 6, kind: output, shape index: {1}]  }
   0x1   :  { %12 = sst [smem:[#allocation2]] %s3844_s4 }
   0x2   :  { %13 = vsyncpa [#allocation4], 0 }
   0x3   :  { %15 = vsyncpa [#allocation4 + $0x1], 0 }
   0x4   :  { %16 = vsyncpa [#allocation6], 0 }
   0x5   :  { %18 = vsyncpa [#allocation6 + $0x1], 0  ;;  %s2899_s23 = smov 0   ;;  %s2901_s24 = smov 0  }
   0x6   :  { %s2903_s25 = smov 0   ;;  %s2905_s26 = smov 0  }
   0x7   :  { %s2907_s27 = smov 0   ;;  %s2909_s28 = smov 0  }
   0x8 LB: > { %s2142_s4 = sadd.s32 4294967295, %s2855_s28   ;;  %s2143_s29 = sadd.s32 4294967294, %s2855_s28   ;;  %s2855_s28 = sphi %s2909_s28, %s24_s28   ;;  %s2851_s27 = sphi %s2907_s27, %s3942_s27   ;;  %s2847_s26 = sphi %s2905_s26, %s3941_s26   ;;  %s2843_s25 = sphi %s2903_s25, %s3940_s25   ;;  %s2839_s24 = sphi %s2901_s24, %s3939_s24   ;;  %s2835_s23 = sphi %s2899_s23, %s3938_s23  }
   0x9   : > { %s36_s30 = sadd.s32 1, %s2851_s27  ;;  %s174_s7 = sadd.s32 1, %s2843_s25 }
   0xa   : > { %p38_p0 = scmp.ge.s32.totalorder %s36_s30, 2  ;;  %p184_p1 = scmp.ne.s32.totalorder %s2843_s25, %s2839_s24 }
   0xb   : > { %p185_p2 = scmp.eq.s32.totalorder %s2142_s4, 1  ;;  %p190_p3 = scmp.ne.s32.totalorder %s2839_s24, %s2835_s23 }
   0xc   : > { %s3944_s30 = smov (%p38_p0, %s36_s30), 0  ;;  %p191_p5 = scmp.eq.s32.totalorder %s2143_s29, 1 }
   0xd   : > { %p2939_p4 = por %p185_p2, %p184_p1  ;;  %s169_s9 = ssub.s32 %s2851_s27, %s3944_s30 }
   0xe   : > { %p2146_p6 = scmp.ge.s32.totalorder %s2855_s28, 1  ;;  %p172_p7 = scmp.eq.s32.totalorder %s169_s9, 0 }
   0xf   : > { %p2946_p8 = por %p191_p5, %p190_p3  ;;  %p282_p9 = scmp.lt.s32.totalorder %s2855_s28, 3 }
  0x10   : > { %s2952_s11 = scalar_select %p172_p7, %s2843_s25, %s174_s7  }
  0x11   : > { %p283_p10 = pnand %p2146_p6, %p282_p9 }
  0x13   : > { %286 = sbr.rel (%p283_p10) target bundleno = 1057 (0x421), region = 40 }
  0x1a   : > { %p341_p11 = scmp.lt.s32.totalorder %s2847_s26, 1  ;;  %s3438_s4 = sand.u32 1, %s2839_s24   ;;  %vm1721_vm0 = vcmask 523264  }
  0x1b   : > { %s2147_s29 = sshll.u32 %s3438_s4, 8  ;;  %s1623_s9 = sld [smem:[#allocation2]] }
  0x1c   : > { %s2956_s12 = scalar_select %p341_p11, %s2847_s26, 1 }
  0x1d   : > { %s3451_s7 = scalar_lea.vmem [#allocation5], %s2147_s29  ;;  %s2281_s17 = sshll.u32 %s2847_s26, 12 }
  0x1e   : > { %s2959_s13 = sshll.u32 %s2956_s12, 7  ;;  %s3691_s20 = scalar_lea.hbm %s3846_s6, %s2281_s17 }
  0x1f   : > { %s2965_s16 = scalar_lea.vmem %s3841_s1, %s2959_s13  ;;  %s2976_s19 = scalar_lea.vmem %s3840_s0, %s2959_s13 }
  0x20   : > { %v2505_v0 = vld [vmem:[%s2965_s16 + $0x40] sm:$0xff]   ;;  %v2507_v2 = vld [vmem:[%s2965_s16 + $0x48] sm:$0xff]   ;;  %v2509_v4 = vld [vmem:[%s2965_s16 + $0x50] sm:$0xff]   ;;  %s3201_s22 = scalar_lea.vmem %s3842_s2, %s2959_s13  ;;  %s2248_s13 = sshll.u32 %s2956_s12, 8 }
  0x21   : > { %v2506_v1 = vld [vmem:[%s2965_s16] sm:$0xff]   ;;  %2283 = vmatprep.subr.bf16.mxu0 %v2505_v0  ;;  %v2508_v3 = vld [vmem:[%s2965_s16 + $0x8] sm:$0xff]   ;;  %v2510_v5 = vld [vmem:[%s2965_s16 + $0x10] sm:$0xff]   ;;  %s3617_s12 = scalar_lea.vmem [#allocation3], %s2147_s29  ;;  %s1986_s21 = sshll.u32 %s3451_s7, 4  ;;  %s3694_s21 = int_to_ptr.vmem [resolvable:$true] %s1986_s21 }
  0x22   : > { %2284 = vmatpush3.bf16.xpose.msra.mxu0 %v2506_v1  ;;  %v2511_v6 = vld [vmem:[%s2965_s16 + $0x58] sm:$0xff]   ;;  %v2521_v7 = vld [vmem:[%s2976_s19] sm:$0xff]   ;;  %v2515_v11 = vld [vmem:[%s2965_s16 + $0x68] sm:$0xff]   ;;  %s2745_s29 = scalar_lea.vmem %s3694_s21, 4096 }
  0x23   : > { %2285 = vmatprep.subr.bf16.mxu0 %v2507_v2  ;;  %2299 = vmatprep.mubr.bf16.mxu0 %v2521_v7  ;;  %v2512_v8 = vld [vmem:[%s2965_s16 + $0x18] sm:$0xff]   ;;  %v2513_v9 = vld [vmem:[%s2965_s16 + $0x60] sm:$0xff]   ;;  %v2516_v12 = vld [vmem:[%s2965_s16 + $0x28] sm:$0xff]   ;;  %p2746_p12 = scmp.ne.s32.totalorder %s3694_s21, %s2745_s29 }
  0x24   : > { %v2514_v10 = vld [vmem:[%s2965_s16 + $0x20] sm:$0xff]   ;;  %v2517_v13 = vld [vmem:[%s2965_s16 + $0x70] sm:$0xff]   ;;  %v2519_v15 = vld [vmem:[%s2965_s16 + $0x78] sm:$0xff]  }
  0x25   : > { %v2518_v14 = vld [vmem:[%s2965_s16 + $0x30] sm:$0xff]   ;;  %v2520_v16 = vld [vmem:[%s2965_s16 + $0x38] sm:$0xff]   ;;  %v2522_v17 = vld [vmem:[%s2976_s19 + $0x8] sm:$0xff]   ;;  %s3607_s16 = scalar_lea.vmem %s3843_s3, %s2248_s13  ;;  %p2747_p13 = pnand %p2746_p12, %p2939_p4 }
  0x26   : > { %v2523_v18 = vld [vmem:[%s2976_s19 + $0x10] sm:$0xff]   ;;  %v2524_v19 = vld [vmem:[%s2976_s19 + $0x18] sm:$0xff]   ;;  %v2525_v20 = vld [vmem:[%s2976_s19 + $0x20] sm:$0xff]  }
  0x27   : > { %v2526_v21 = vld [vmem:[%s2976_s19 + $0x28] sm:$0xff]   ;;  %v2527_v22 = vld [vmem:[%s2976_s19 + $0x30] sm:$0xff]   ;;  %v2528_v23 = vld [vmem:[%s2976_s19 + $0x38] sm:$0xff]   ;;  %p2748_p0 = pneg %p2747_p13 }
  0x28   : > { %v2529_v24 = vld [vmem:[%s2976_s19 + $0x40] sm:$0xff]   ;;  %v2530_v25 = vld [vmem:[%s2976_s19 + $0x48] sm:$0xff]   ;;  %v2531_v26 = vld [vmem:[%s2976_s19 + $0x50] sm:$0xff]  }
  0x29   : > { %v2532_v27 = vld [vmem:[%s2976_s19 + $0x58] sm:$0xff]   ;;  %v2533_v28 = vld [vmem:[%s2976_s19 + $0x60] sm:$0xff]   ;;  %v2534_v29 = vld [vmem:[%s2976_s19 + $0x68] sm:$0xff]  }
  0x2a   : > { %2286 = vmatpush3.bf16.xpose.msra.mxu0 %v2508_v3  ;;  %v2535_v30 = vld [vmem:[%s2976_s19 + $0x70] sm:$0xff]   ;;  %v2536_v31 = vld [vmem:[%s2976_s19 + $0x78] sm:$0xff]  }
  0x2b   : > { %2287 = vmatprep.subr.bf16.mxu0 %v2509_v4 }
  0x32   : > { %2288 = vmatpush3.bf16.xpose.msra.mxu0 %v2510_v5 }
  0x33   : > { %2289 = vmatprep.subr.bf16.mxu0 %v2511_v6 }
  0x3a   : > { %2290 = vmatpush3.bf16.xpose.msra.mxu0 %v2512_v8 }
  0x3b   : > { %2291 = vmatprep.subr.bf16.mxu0 %v2513_v9 }
  0x42   : > { %2292 = vmatpush3.bf16.xpose.msra.mxu0 %v2514_v10 }
  0x43   : > { %2293 = vmatprep.subr.bf16.mxu0 %v2515_v11 }
  0x4a   : > { %2294 = vmatpush3.bf16.xpose.msra.mxu0 %v2516_v12 }
  0x4b   : > { %2295 = vmatprep.subr.bf16.mxu0 %v2517_v13 }
  0x52   : > { %2296 = vmatpush3.bf16.xpose.msra.mxu0 %v2518_v14 }
  0x53   : > { %2297 = vmatprep.subr.bf16.mxu0 %v2519_v15 }
  0x5a   : > { %2298 = vmatpush3.bf16.xpose.msra.mxu0 %v2520_v16 }
  0x61   : > { %2300 = vmatmul.mubr.bf16.vlgmr.msra.gmra.mrb[0].mxu0 %v2521_v7 }
  0x62   : > { %2301 = vmatprep.mubr.bf16.mxu0 %v2522_v17 }
  0x69   : > { %2302 = vmatmul.mubr.bf16.gmra.mrb[4].mxu0 %v2522_v17 }
  0x6a   : > { %2303 = vmatprep.mubr.bf16.mxu0 %v2523_v18 }
  0x71   : > { %2304 = vmatmul.mubr.bf16.gmra.mrb[8].mxu0 %v2523_v18 }
  0x72   : > { %2305 = vmatprep.mubr.bf16.mxu0 %v2524_v19 }
  0x79   : > { %2306 = vmatmul.mubr.bf16.gmra.mrb[12].mxu0 %v2524_v19 }
  0x7a   : > { %2307 = vmatprep.mubr.bf16.mxu0 %v2525_v20 }
  0x81   : > { %2308 = vmatmul.mubr.bf16.gmra.mrb[16].mxu0 %v2525_v20 }
  0x82   : > { %2309 = vmatprep.mubr.bf16.mxu0 %v2526_v21 }
  0x89   : > { %2310 = vmatmul.mubr.bf16.gmra.mrb[20].mxu0 %v2526_v21 }
  0x8a   : > { %2311 = vmatprep.mubr.bf16.mxu0 %v2527_v22 }
  0x91   : > { %2312 = vmatmul.mubr.bf16.gmra.mrb[24].mxu0 %v2527_v22 }
  0x92   : > { %2313 = vmatprep.mubr.bf16.mxu0 %v2528_v23 }
  0x99   : > { %2314 = vmatmul.mubr.bf16.gmra.mrb[28].mxu0 %v2528_v23 }
  0x9a   : > { %2315 = vmatprep.mubr.bf16.mxu0 %v2529_v24 }
  0xa1   : > { %2316 = vmatmul.mubr.bf16.gmra.mrb[32].mxu0 %v2529_v24 }
  0xa2   : > { %2317 = vmatprep.mubr.bf16.mxu0 %v2530_v25 }
  0xa9   : > { %2318 = vmatmul.mubr.bf16.gmra.mrb[36].mxu0 %v2530_v25 }
  0xaa   : > { %2319 = vmatprep.mubr.bf16.mxu0 %v2531_v26 }
  0xb1   : > { %2320 = vmatmul.mubr.bf16.gmra.mrb[40].mxu0 %v2531_v26 }
  0xb2   : > { %2321 = vmatprep.mubr.bf16.mxu0 %v2532_v27 }
  0xb9   : > { %2322 = vmatmul.mubr.bf16.gmra.mrb[44].mxu0 %v2532_v27 }
  0xba   : > { %2323 = vmatprep.mubr.bf16.mxu0 %v2533_v28 }
  0xc1   : > { %2324 = vmatmul.mubr.bf16.gmra.mrb[48].mxu0 %v2533_v28 }
  0xc2   : > { %2325 = vmatprep.mubr.bf16.mxu0 %v2534_v29 }
  0xc9   : > { %2326 = vmatmul.mubr.bf16.gmra.mrb[52].mxu0 %v2534_v29 }
  0xca   : > { %2327 = vmatprep.mubr.bf16.mxu0 %v2535_v30 }
  0xd1   : > { %2328 = vmatmul.mubr.bf16.gmra.mrb[56].mxu0 %v2535_v30 }
  0xd2   : > { %2329 = vmatprep.mubr.bf16.mxu0 %v2536_v31 }
  0xd9   : > { %2330 = vmatmul.mubr.bf16.gmra.mrb[60].mxu0 %v2536_v31 }
 0x134   : > { %v3005_v32 = vpop.f32.mrb[0].mxu0 }
 0x135   : > { %v3007_v33 = vpop.f32.mrb[1].mxu0 }
 0x136   : > { %v3009_v34 = vpop.f32.mrb[2].mxu0  ;;  %v822_v35 = vmax.f32 %v3005_v32, %v3007_v33 }
 0x137   : > { %v3013_v36 = vpop.f32.mrb[3].mxu0 }
 0x138   : > { %823 = vmax.xlane.f32.xlu0 %v822_v35  ;;  %v825_v37 = vmax.f32 %v3009_v34, %v3013_v36 }
 0x13c   : > { %826 = vmax.xlane.f32.xlu0 %v825_v37  ;;  %v3017_v38 = vpop.f32.mrb[4].mxu0 }
 0x13d   : > { %v3019_v39 = vpop.f32.mrb[5].mxu0 }
 0x13e   : > { %v3021_v40 = vpop.f32.mrb[6].mxu0  ;;  %v828_v41 = vmax.f32 %v3017_v38, %v3019_v39 }
 0x13f   : > { %v3025_v42 = vpop.f32.mrb[7].mxu0 }
 0x140   : > { %829 = vmax.xlane.f32.xlu1 %v828_v41  ;;  %v831_v43 = vmax.f32 %v3021_v40, %v3025_v42 }
 0x144   : > { %832 = vmax.xlane.f32.xlu1 %v831_v43  ;;  %v3029_v44 = vpop.f32.mrb[8].mxu0 }
 0x145   : > { %v3031_v45 = vpop.f32.mrb[9].mxu0 }
 0x146   : > { %v3033_v46 = vpop.f32.mrb[10].mxu0  ;;  %v834_v47 = vmax.f32 %v3029_v44, %v3031_v45 }
 0x147   : > { %v3037_v48 = vpop.f32.mrb[11].mxu0 }
 0x148   : > { %835 = vmax.xlane.f32.xlu0 %v834_v47  ;;  %v837_v49 = vmax.f32 %v3033_v46, %v3037_v48 }
 0x14a   : > { %838 = vmax.xlane.f32.xlu1 %v837_v49 }
 0x14c   : > { %v3041_v50 = vpop.f32.mrb[12].mxu0 }
 0x14d   : > { %v3043_v51 = vpop.f32.mrb[13].mxu0 }
 0x14e   : > { %v3045_v52 = vpop.f32.mrb[14].mxu0  ;;  %v840_v53 = vmax.f32 %v3041_v50, %v3043_v51 }
 0x14f   : > { %v3049_v54 = vpop.f32.mrb[15].mxu0 }
 0x150   : > { %841 = vmax.xlane.f32.xlu0 %v840_v53  ;;  %v843_v55 = vmax.f32 %v3045_v52, %v3049_v54 }
 0x152   : > { %844 = vmax.xlane.f32.xlu1 %v843_v55 }
 0x154   : > { %v3053_v56 = vpop.f32.mrb[16].mxu0 }
 0x155   : > { %v3055_v57 = vpop.f32.mrb[17].mxu0 }
 0x156   : > { %v3057_v58 = vpop.f32.mrb[18].mxu0  ;;  %v846_v59 = vmax.f32 %v3053_v56, %v3055_v57 }
 0x157   : > { %v3061_v60 = vpop.f32.mrb[19].mxu0 }
 0x158   : > { %847 = vmax.xlane.f32.xlu0 %v846_v59  ;;  %v849_v61 = vmax.f32 %v3057_v58, %v3061_v60 }
 0x15a   : > { %850 = vmax.xlane.f32.xlu1 %v849_v61 }
 0x15c   : > { %v3065_v62 = vpop.f32.mrb[20].mxu0 }
 0x15d   : > { %v3067_v63 = vpop.f32.mrb[21].mxu0 }
 0x15e   : > { %v3069_v0 = vpop.f32.mrb[22].mxu0  ;;  %v852_v1 = vmax.f32 %v3065_v62, %v3067_v63 }
 0x15f   : > { %v3073_v2 = vpop.f32.mrb[23].mxu0 }
 0x160   : > { %853 = vmax.xlane.f32.xlu0 %v852_v1  ;;  %v855_v3 = vmax.f32 %v3069_v0, %v3073_v2 }
 0x162   : > { %856 = vmax.xlane.f32.xlu1 %v855_v3  ;;  %v2537_v3 = vld [vmem:[%s3201_s22 + $0x40] sm:$0xff]  }
 0x163   : > { %2331 = vmatprep.subr.bf16.mxu1 %v2537_v3 }
 0x164   : > { %v3077_v4 = vpop.f32.mrb[24].mxu0 }
 0x165   : > { %v3079_v5 = vpop.f32.mrb[25].mxu0 }
 0x166   : > { %v3081_v6 = vpop.f32.mrb[26].mxu0  ;;  %v858_v7 = vmax.f32 %v3077_v4, %v3079_v5 }
 0x167   : > { %v3085_v8 = vpop.f32.mrb[27].mxu0 }
 0x168   : > { %859 = vmax.xlane.f32.xlu0 %v858_v7  ;;  %v861_v9 = vmax.f32 %v3081_v6, %v3085_v8 }
 0x16a   : > { %862 = vmax.xlane.f32.xlu1 %v861_v9 }
 0x16c   : > { %v3089_v10 = vpop.f32.mrb[28].mxu0 }
 0x16d   : > { %v3091_v11 = vpop.f32.mrb[29].mxu0 }
 0x16e   : > { %v3093_v12 = vpop.f32.mrb[30].mxu0  ;;  %v864_v13 = vmax.f32 %v3089_v10, %v3091_v11 }
 0x16f   : > { %v3097_v14 = vpop.f32.mrb[31].mxu0 }
 0x170   : > { %865 = vmax.xlane.f32.xlu0 %v864_v13  ;;  %v867_v15 = vmax.f32 %v3093_v12, %v3097_v14 }
 0x172   : > { %868 = vmax.xlane.f32.xlu1 %v867_v15 }
 0x174   : > { %v3101_v16 = vpop.f32.mrb[32].mxu0 }
 0x175   : > { %v3103_v17 = vpop.f32.mrb[33].mxu0 }
 0x176   : > { %v3105_v18 = vpop.f32.mrb[34].mxu0  ;;  %v870_v19 = vmax.f32 %v3101_v16, %v3103_v17 }
 0x177   : > { %3876 = vst [vmem:[#allocation9_spill] sm:$0xff] %v3105_v18  ;;  %v3109_v20 = vpop.f32.mrb[35].mxu0 }
 0x178   : > { %3877 = vst [vmem:[#allocation10_spill] sm:$0xff] %v3109_v20  ;;  %871 = vmax.xlane.f32.xlu0 %v870_v19  ;;  %v873_v21 = vmax.f32 %v3105_v18, %v3109_v20 }
 0x17a   : > { %874 = vmax.xlane.f32.xlu1 %v873_v21 }
 0x17c   : > { %v3113_v22 = vpop.f32.mrb[36].mxu0 }
 0x17d   : > { %3878 = vst [vmem:[#allocation11_spill] sm:$0xff] %v3113_v22  ;;  %v3115_v23 = vpop.f32.mrb[37].mxu0 }
 0x17e   : > { %3879 = vst [vmem:[#allocation12_spill] sm:$0xff] %v3115_v23  ;;  %v3117_v24 = vpop.f32.mrb[38].mxu0  ;;  %v876_v25 = vmax.f32 %v3113_v22, %v3115_v23 }
 0x17f   : > { %3880 = vst [vmem:[#allocation13_spill] sm:$0xff] %v3117_v24  ;;  %v3121_v26 = vpop.f32.mrb[39].mxu0 }
 0x180   : > { %3881 = vst [vmem:[#allocation14_spill] sm:$0xff] %v3121_v26  ;;  %877 = vmax.xlane.f32.xlu0 %v876_v25  ;;  %v879_v27 = vmax.f32 %v3117_v24, %v3121_v26 }
 0x182   : > { %880 = vmax.xlane.f32.xlu1 %v879_v27  ;;  %v2539_v27 = vld [vmem:[%s3201_s22 + $0x48] sm:$0xff]  }
 0x184   : > { %v3125_v28 = vpop.f32.mrb[40].mxu0 }
 0x185   : > { %3882 = vst [vmem:[#allocation15_spill] sm:$0xff] %v3125_v28  ;;  %v3127_v29 = vpop.f32.mrb[41].mxu0 }
 0x186   : > { %3883 = vst [vmem:[#allocation16_spill] sm:$0xff] %v3127_v29  ;;  %v3129_v30 = vpop.f32.mrb[42].mxu0  ;;  %v882_v31 = vmax.f32 %v3125_v28, %v3127_v29 }
 0x187   : > { %3884 = vst [vmem:[#allocation17_spill] sm:$0xff] %v3129_v30  ;;  %v3133_v35 = vpop.f32.mrb[43].mxu0 }
 0x188   : > { %3885 = vst [vmem:[#allocation18_spill] sm:$0xff] %v3133_v35  ;;  %883 = vmax.xlane.f32.xlu0 %v882_v31  ;;  %v885_v37 = vmax.f32 %v3129_v30, %v3133_v35  ;;  %v2540_v35 = vld [vmem:[%s3201_s22 + $0x8] sm:$0xff]   ;;  %v2541_v30 = vld [vmem:[%s3201_s22 + $0x50] sm:$0xff]  }
 0x18a   : > { %886 = vmax.xlane.f32.xlu1 %v885_v37 }
 0x18c   : > { %v3137_v41 = vpop.f32.mrb[44].mxu0 }
 0x18d   : > { %3886 = vst [vmem:[#allocation19_spill] sm:$0xff] %v3137_v41  ;;  %v3139_v43 = vpop.f32.mrb[45].mxu0 }
 0x18e   : > { %3887 = vst [vmem:[#allocation20_spill] sm:$0xff] %v3139_v43  ;;  %v3141_v47 = vpop.f32.mrb[46].mxu0  ;;  %v888_v49 = vmax.f32 %v3137_v41, %v3139_v43  ;;  %v2542_v41 = vld [vmem:[%s3201_s22 + $0x10] sm:$0xff]  }
 0x18f   : > { %3888 = vst [vmem:[#allocation21_spill] sm:$0xff] %v3141_v47  ;;  %v3145_v53 = vpop.f32.mrb[47].mxu0 }
 0x190   : > { %3889 = vst [vmem:[#allocation22_spill] sm:$0xff] %v3145_v53  ;;  %889 = vmax.xlane.f32.xlu0 %v888_v49  ;;  %v891_v55 = vmax.f32 %v3141_v47, %v3145_v53 }
 0x192   : > { %892 = vmax.xlane.f32.xlu1 %v891_v55  ;;  %v2538_v55 = vld [vmem:[%s3201_s22] sm:$0xff]  }
 0x193   : > { %2332 = vmatpush3.bf16.msra.mxu1 %v2538_v55 }
 0x194   : > { %v3149_v59 = vpop.f32.mrb[48].mxu0  ;;  %2333 = vmatprep.subr.bf16.mxu1 %v2539_v27 }
 0x195   : > { %v3151_v61 = vpop.f32.mrb[49].mxu0 }
 0x196   : > { %v3153_v1 = vpop.f32.mrb[50].mxu0 }
 0x197   : > { %v3157_v7 = vpop.f32.mrb[51].mxu0  ;;  %2334 = vmatpush3.bf16.msra.mxu1 %v2540_v35 }
 0x198   : > { %2335 = vmatprep.subr.bf16.mxu1 %v2541_v30 }
 0x19b   : > { %2336 = vmatpush3.bf16.msra.mxu1 %v2542_v41 }
 0x19c   : > { %v3161_v13 = vpop.f32.mrb[52].mxu0 }
 0x19d   : > { %v3163_v15 = vpop.f32.mrb[53].mxu0 }
 0x19e   : > { %v3165_v19 = vpop.f32.mrb[54].mxu0 }
 0x19f   : > { %v3169_v25 = vpop.f32.mrb[55].mxu0 }
 0x1a4   : > { %v3173_v31 = vpop.f32.mrb[56].mxu0 }
 0x1a5   : > { %v3175_v37 = vpop.f32.mrb[57].mxu0 }
 0x1a6   : > { %v3177_v49 = vpop.f32.mrb[58].mxu0 }
 0x1a7   : > { %v3181_v9 = vpop.f32.mrb[59].mxu0 }
 0x1ac   : > { %v3185_v21 = vpop.f32.mrb[60].mxu0 }
 0x1ad   : > { %v3187_v53 = vpop.f32.mrb[61].mxu0 }
 0x1ae   : > { %v3189_v47 = vpop.f32.mrb[62].mxu0 }
 0x1af   : > { %v3193_v43 = vpop.f32.mrb[63].mxu0 }
 0x1c5   : > { %v824_v29 = vpop.xlane.xlu0 %823 }
 0x1c6   : > { %v918_v28 = vsub.f32 %v3005_v32, %v824_v29  ;;  %v919_v26 = vsub.f32 %v3007_v33, %v824_v29 }
 0x1c8   : > { %v982_v24 = vmul.f32 1.442695, %v918_v28  ;;  %v984_v23 = vmul.f32 1.442695, %v919_v26 }
 0x1c9   : > { %v827_v22 = vpop.xlane.xlu0 %826 }
 0x1ca   : > { %2553 = vpow2.f32 %v982_v24  ;;  %v920_v3 = vsub.f32 %v3009_v34, %v827_v22  ;;  %v921_v55 = vsub.f32 %v3013_v36, %v827_v22 }
 0x1cb   : > { %2555 = vpow2.f32 %v984_v23 }
 0x1cc   : > { %v986_v27 = vmul.f32 1.442695, %v920_v3  ;;  %v988_v20 = vmul.f32 1.442695, %v921_v55 }
 0x1cd   : > { %v830_v18 = vpop.xlane.xlu1 %829 }
 0x1ce   : > { %2557 = vpow2.f32 %v986_v27  ;;  %v922_v30 = vsub.f32 %v3017_v38, %v830_v18  ;;  %v923_v35 = vsub.f32 %v3019_v39, %v830_v18 }
 0x1cf   : > { %2559 = vpow2.f32 %v988_v20 }
 0x1d0   : > { %v990_v32 = vmul.f32 1.442695, %v922_v30  ;;  %v992_v33 = vmul.f32 1.442695, %v923_v35 }
 0x1d1   : > { %v833_v28 = vpop.xlane.xlu1 %832 }
 0x1d2   : > { %2561 = vpow2.f32 %v990_v32  ;;  %v924_v24 = vsub.f32 %v3021_v40, %v833_v28  ;;  %v925_v34 = vsub.f32 %v3025_v42, %v833_v28  ;;  %v3890_v32 = vmax.f32 %v3149_v59, %v3151_v61 }
 0x1d3   : > { %2563 = vpow2.f32 %v992_v33 }
 0x1d4   : > { %v3217_v36 = vpop.eup %2553  ;;  %v994_v22 = vmul.f32 1.442695, %v924_v24  ;;  %v996_v23 = vmul.f32 1.442695, %v925_v34 }
 0x1d5   : > { %v3219_v26 = vpop.eup %2555  ;;  %v836_v29 = vpop.xlane.xlu0 %835 }
 0x1d6   : > { %2565 = vpow2.f32 %v994_v22  ;;  %v926_v38 = vsub.f32 %v3029_v44, %v836_v29  ;;  %v927_v39 = vsub.f32 %v3031_v45, %v836_v29  ;;  %v1110_v18 = vadd.f32 %v3219_v26, %v3217_v36 }
 0x1d7   : > { %2567 = vpow2.f32 %v996_v23  ;;  %v839_v40 = vpop.xlane.xlu1 %838 }
 0x1d8   : > { %v3225_v20 = vpop.eup %2557  ;;  %v998_v42 = vmul.f32 1.442695, %v926_v38  ;;  %v1000_v41 = vmul.f32 1.442695, %v927_v39  ;;  %v928_v3 = vsub.f32 %v3033_v46, %v839_v40  ;;  %v929_v55 = vsub.f32 %v3037_v48, %v839_v40  ;;  %1111 = vadd.xlane.f32.xlu0 %v1110_v18 }
 0x1d9   : > { %v3229_v27 = vpop.eup %2559  ;;  %v3891_v18 = vmax.f32 %v3153_v1, %v3157_v7 }
 0x1da   : > { %2569 = vpow2.f32 %v998_v42  ;;  %v1002_v44 = vmul.f32 1.442695, %v928_v3  ;;  %v1004_v30 = vmul.f32 1.442695, %v929_v55  ;;  %v1113_v45 = vadd.f32 %v3229_v27, %v3225_v20  ;;  %v2543_v55 = vld [vmem:[%s3201_s22 + $0x58] sm:$0xff]  }
 0x1db   : > { %2571 = vpow2.f32 %v1000_v41  ;;  %2337 = vmatprep.subr.bf16.mxu1 %v2543_v55 }
 0x1dc   : > { %v3233_v35 = vpop.eup %2561  ;;  %2573 = vpow2.f32 %v1002_v44  ;;  %1114 = vadd.xlane.f32.xlu1 %v1113_v45  ;;  %895 = vmax.xlane.f32.xlu0 %v3890_v32 }
 0x1dd   : > { %v3238_v46 = vpop.eup %2563  ;;  %2575 = vpow2.f32 %v1004_v30  ;;  %v842_v48 = vpop.xlane.xlu0 %841 }
 0x1de   : > { %v930_v33 = vsub.f32 %v3041_v50, %v842_v48  ;;  %v931_v28 = vsub.f32 %v3043_v51, %v842_v48  ;;  %v1116_v24 = vadd.f32 %v3238_v46, %v3233_v35  ;;  %v2544_v48 = vld [vmem:[%s3201_s22 + $0x18] sm:$0xff]  }
 0x1df   : > { %v845_v34 = vpop.xlane.xlu1 %844  ;;  %2338 = vmatpush3.bf16.msra.mxu1 %v2544_v48 }
 0x1e0   : > { %v3244_v22 = vpop.eup %2565  ;;  %v1006_v23 = vmul.f32 1.442695, %v930_v33  ;;  %v1008_v29 = vmul.f32 1.442695, %v931_v28  ;;  %v932_v38 = vsub.f32 %v3045_v52, %v845_v34  ;;  %v933_v39 = vsub.f32 %v3049_v54, %v845_v34  ;;  %1117 = vadd.xlane.f32.xlu0 %v1116_v24  ;;  %898 = vmax.xlane.f32.xlu1 %v3891_v18 }
 0x1e1   : > { %v3251_v50 = vpop.eup %2567  ;;  %v3892_v52 = vmax.f32 %v3161_v13, %v3163_v15 }
 0x1e2   : > { %2577 = vpow2.f32 %v1006_v23  ;;  %v1010_v51 = vmul.f32 1.442695, %v932_v38  ;;  %v1012_v40 = vmul.f32 1.442695, %v933_v39  ;;  %v1119_v42 = vadd.f32 %v3251_v50, %v3244_v22 }
 0x1e3   : > { %2579 = vpow2.f32 %v1008_v29 }
 0x1e4   : > { %v3255_v41 = vpop.eup %2569  ;;  %2581 = vpow2.f32 %v1010_v51  ;;  %1120 = vadd.xlane.f32.xlu1 %v1119_v42  ;;  %901 = vmax.xlane.f32.xlu0 %v3892_v52  ;;  %v2546_v51 = vld [vmem:[%s3201_s22 + $0x20] sm:$0xff]  }
 0x1e5   : > { %v3260_v54 = vpop.eup %2571  ;;  %2583 = vpow2.f32 %v1012_v40  ;;  %v848_v3 = vpop.xlane.xlu0 %847 }
 0x1e6   : > { %v3263_v44 = vpop.eup %2573  ;;  %v934_v30 = vsub.f32 %v3053_v56, %v848_v3  ;;  %v935_v45 = vsub.f32 %v3055_v57, %v848_v3  ;;  %v1122_v32 = vadd.f32 %v3260_v54, %v3255_v41  ;;  %v3893_v56 = vmax.f32 %v3165_v19, %v3169_v25  ;;  %v2545_v57 = vld [vmem:[%s3201_s22 + $0x60] sm:$0xff]  }
 0x1e7   : > { %v3270_v33 = vpop.eup %2575  ;;  %v851_v28 = vpop.xlane.xlu1 %850  ;;  %2339 = vmatprep.subr.bf16.mxu1 %v2545_v57 }
 0x1e8   : > { %v1014_v24 = vmul.f32 1.442695, %v934_v30  ;;  %v1016_v34 = vmul.f32 1.442695, %v935_v45  ;;  %v936_v23 = vsub.f32 %v3057_v58, %v851_v28  ;;  %v937_v29 = vsub.f32 %v3061_v60, %v851_v28  ;;  %1123 = vadd.xlane.f32.xlu0 %v1122_v32  ;;  %904 = vmax.xlane.f32.xlu1 %v3893_v56  ;;  %v2547_v45 = vld [vmem:[%s3201_s22 + $0x68] sm:$0xff]  }
 0x1e9   : > { %v1125_v18 = vadd.f32 %v3270_v33, %v3263_v44  ;;  %v3894_v60 = vmax.f32 %v3173_v31, %v3175_v37  ;;  %2340 = vmatpush3.bf16.msra.mxu1 %v2546_v51  ;;  %v2548_v28 = vld [vmem:[%s3201_s22 + $0x28] sm:$0xff]  }
 0x1ea   : > { %2585 = vpow2.f32 %v1014_v24  ;;  %v1018_v38 = vmul.f32 1.442695, %v936_v23  ;;  %v1020_v39 = vmul.f32 1.442695, %v937_v29  ;;  %2341 = vmatprep.subr.bf16.mxu1 %v2547_v45 }
 0x1eb   : > { %2587 = vpow2.f32 %v1016_v34 }
 0x1ec   : > { %v3281_v58 = vpop.eup %2577  ;;  %2589 = vpow2.f32 %v1018_v38  ;;  %1126 = vadd.xlane.f32.xlu1 %v1125_v18  ;;  %907 = vmax.xlane.f32.xlu0 %v3894_v60  ;;  %v2549_v38 = vld [vmem:[%s3201_s22 + $0x70] sm:$0xff]  }
 0x1ed   : > { %v3286_v40 = vpop.eup %2579  ;;  %2591 = vpow2.f32 %v1020_v39  ;;  %v854_v42 = vpop.xlane.xlu0 %853  ;;  %2342 = vmatpush3.bf16.msra.mxu1 %v2548_v28  ;;  %v2550_v39 = vld [vmem:[%s3201_s22 + $0x30] sm:$0xff]   ;;  %v2552_v28 = vld [vmem:[%s3201_s22 + $0x38] sm:$0xff]  }
 0x1ee   : > { %v3288_v52 = vpop.eup %2581  ;;  %v938_v3 = vsub.f32 %v3065_v62, %v854_v42  ;;  %v939_v55 = vsub.f32 %v3067_v63, %v854_v42  ;;  %v1128_v30 = vadd.f32 %v3286_v40, %v3281_v58  ;;  %v3895_v62 = vmax.f32 %v3177_v49, %v3181_v9  ;;  %2343 = vmatprep.subr.bf16.mxu1 %v2549_v38 }
 0x1ef   : > { %v3295_v32 = vpop.eup %2583  ;;  %v857_v48 = vpop.xlane.xlu1 %856 }
 0x1f0   : > { %v1022_v24 = vmul.f32 1.442695, %v938_v3  ;;  %v1024_v34 = vmul.f32 1.442695, %v939_v55  ;;  %v940_v23 = vsub.f32 %v3069_v0, %v857_v48  ;;  %v941_v29 = vsub.f32 %v3073_v2, %v857_v48  ;;  %1129 = vadd.xlane.f32.xlu0 %v1128_v30  ;;  %910 = vmax.xlane.f32.xlu1 %v3895_v62  ;;  %v2551_v30 = vld [vmem:[%s3201_s22 + $0x78] sm:$0xff]   ;;  %s1952_s22 = scalar_lea.sflag [#allocation6], %s3438_s4 }
 0x1f1   : > { %v1131_v57 = vadd.f32 %v3295_v32, %v3288_v52  ;;  %v3896_v2 = vmax.f32 %v3185_v21, %v3187_v53  ;;  %2344 = vmatpush3.bf16.msra.mxu1 %v2550_v39 }
 0x1f2   : > { %2593 = vpow2.f32 %v1022_v24  ;;  %v1026_v63 = vmul.f32 1.442695, %v940_v23  ;;  %v1028_v56 = vmul.f32 1.442695, %v941_v29  ;;  %2345 = vmatprep.subr.bf16.mxu1 %v2551_v30 }
 0x1f3   : > { %2595 = vpow2.f32 %v1024_v34 }
 0x1f4   : > { %v3307_v0 = vpop.eup %2585  ;;  %2597 = vpow2.f32 %v1026_v63  ;;  %1132 = vadd.xlane.f32.xlu1 %v1131_v57  ;;  %913 = vmax.xlane.f32.xlu0 %v3896_v2 }
 0x1f5   : > { %v3312_v18 = vpop.eup %2587  ;;  %2599 = vpow2.f32 %v1028_v56  ;;  %v860_v51 = vpop.xlane.xlu0 %859  ;;  %2346 = vmatpush3.bf16.msra.mxu1 %v2552_v28 }
 0x1f6   : > { %v3314_v60 = vpop.eup %2589  ;;  %v942_v42 = vsub.f32 %v3077_v4, %v860_v51  ;;  %v943_v3 = vsub.f32 %v3079_v5, %v860_v51  ;;  %v1134_v55 = vadd.f32 %v3312_v18, %v3307_v0  ;;  %v3897_v4 = vmax.f32 %v3189_v47, %v3193_v43 }
 0x1f7   : > { %v3321_v45 = vpop.eup %2591  ;;  %v863_v48 = vpop.xlane.xlu1 %862 }
 0x1f8   : > { %v1030_v24 = vmul.f32 1.442695, %v942_v42  ;;  %v1032_v34 = vmul.f32 1.442695, %v943_v3  ;;  %v944_v23 = vsub.f32 %v3081_v6, %v863_v48  ;;  %v945_v29 = vsub.f32 %v3085_v8, %v863_v48  ;;  %1135 = vadd.xlane.f32.xlu0 %v1134_v55  ;;  %916 = vmax.xlane.f32.xlu1 %v3897_v4 }
 0x1f9   : > { %v1137_v63 = vadd.f32 %v3321_v45, %v3314_v60 }
 0x1fa   : > { %2601 = vpow2.f32 %v1030_v24  ;;  %v1034_v5 = vmul.f32 1.442695, %v944_v23  ;;  %v1036_v62 = vmul.f32 1.442695, %v945_v29 }
 0x1fb   : > { %2603 = vpow2.f32 %v1032_v34 }
 0x1fc   : > { %v3331_v56 = vpop.eup %2593  ;;  %2605 = vpow2.f32 %v1034_v5  ;;  %1138 = vadd.xlane.f32.xlu1 %v1137_v63 }
 0x1fd   : > { %v3333_v6 = vpop.eup %2595  ;;  %2607 = vpow2.f32 %v1036_v62  ;;  %v866_v8 = vpop.xlane.xlu0 %865 }
 0x1fe   : > { %v3335_v57 = vpop.eup %2597  ;;  %v946_v38 = vsub.f32 %v3089_v10, %v866_v8  ;;  %v947_v39 = vsub.f32 %v3091_v11, %v866_v8  ;;  %v1140_v2 = vadd.f32 %v3333_v6, %v3331_v56 }
 0x1ff   : > { %v3341_v51 = vpop.eup %2599  ;;  %v869_v42 = vpop.xlane.xlu1 %868 }
 0x200   : > { %v1038_v3 = vmul.f32 1.442695, %v946_v38  ;;  %v1040_v55 = vmul.f32 1.442695, %v947_v39  ;;  %v948_v30 = vsub.f32 %v3093_v12, %v869_v42  ;;  %v949_v48 = vsub.f32 %v3097_v14, %v869_v42  ;;  %1141 = vadd.xlane.f32.xlu0 %v1140_v2  ;;  %v3898_v38 = vld [vmem:[#allocation9_spill] sm:$0xff]  ;;  %v3899_v2 = vld [vmem:[#allocation10_spill] sm:$0xff] }
 0x201   : > { %v1143_v28 = vadd.f32 %v3341_v51, %v3335_v57 }
 0x202   : > { %2609 = vpow2.f32 %v1038_v3  ;;  %v1042_v10 = vmul.f32 1.442695, %v948_v30  ;;  %v1044_v24 = vmul.f32 1.442695, %v949_v48 }
 0x203   : > { %2611 = vpow2.f32 %v1040_v55  ;;  %1144 = vadd.xlane.f32.xlu1 %v1143_v28 }
 0x204   : > { %v3347_v11 = vpop.eup %2601  ;;  %2613 = vpow2.f32 %v1042_v10  ;;  %v3902_v10 = vld [vmem:[#allocation11_spill] sm:$0xff] }
 0x205   : > { %v3349_v34 = vpop.eup %2603  ;;  %2615 = vpow2.f32 %v1044_v24  ;;  %v872_v23 = vpop.xlane.xlu0 %871 }
 0x206   : > { %v3351_v29 = vpop.eup %2605  ;;  %v950_v12 = vsub.f32 %v3101_v16, %v872_v23  ;;  %v951_v14 = vsub.f32 %v3103_v17, %v872_v23  ;;  %v1146_v4 = vadd.f32 %v3349_v34, %v3347_v11  ;;  %v3903_v23 = vld [vmem:[#allocation12_spill] sm:$0xff] }
 0x207   : > { %v3357_v5 = vpop.eup %2607  ;;  %v875_v62 = vpop.xlane.xlu1 %874 }
 0x208   : > { %v1046_v63 = vmul.f32 1.442695, %v950_v12  ;;  %v1048_v8 = vmul.f32 1.442695, %v951_v14  ;;  %v952_v39 = vsub.f32 %v3898_v38, %v875_v62  ;;  %v953_v42 = vsub.f32 %v3899_v2, %v875_v62  ;;  %1147 = vadd.xlane.f32.xlu0 %v1146_v4  ;;  %v3905_v38 = vld [vmem:[#allocation13_spill] sm:$0xff]  ;;  %v3906_v2 = vld [vmem:[#allocation14_spill] sm:$0xff] }
 0x209   : > { %v1149_v3 = vadd.f32 %v3357_v5, %v3351_v29 }
 0x20a   : > { %2617 = vpow2.f32 %v1046_v63  ;;  %v1050_v16 = vmul.f32 1.442695, %v952_v39  ;;  %v1052_v55 = vmul.f32 1.442695, %v953_v42 }
 0x20b   : > { %2619 = vpow2.f32 %v1048_v8  ;;  %1150 = vadd.xlane.f32.xlu1 %v1149_v3 }
 0x20c   : > { %v3363_v17 = vpop.eup %2609  ;;  %2621 = vpow2.f32 %v1050_v16 }
 0x20d   : > { %3900 = vst [vmem:[#allocation9_spill] sm:$0xff] %v3363_v17  ;;  %v3365_v30 = vpop.eup %2611  ;;  %2623 = vpow2.f32 %v1052_v55  ;;  %v878_v48 = vpop.xlane.xlu0 %877 }
 0x20e   : > { %v3367_v28 = vpop.eup %2613  ;;  %v954_v24 = vsub.f32 %v3902_v10, %v878_v48  ;;  %v955_v12 = vsub.f32 %v3903_v23, %v878_v48  ;;  %v1152_v14 = vadd.f32 %v3365_v30, %v3363_v17 }
 0x20f   : > { %3901 = vst [vmem:[#allocation10_spill] sm:$0xff] %v3367_v28  ;;  %v3373_v4 = vpop.eup %2615  ;;  %v881_v62 = vpop.xlane.xlu1 %880 }
 0x210   : > { %3904 = vst [vmem:[#allocation11_spill] sm:$0xff] %v3373_v4  ;;  %v1054_v63 = vmul.f32 1.442695, %v954_v24  ;;  %v1056_v8 = vmul.f32 1.442695, %v955_v12  ;;  %v956_v39 = vsub.f32 %v3905_v38, %v881_v62  ;;  %v957_v42 = vsub.f32 %v3906_v2, %v881_v62  ;;  %1153 = vadd.xlane.f32.xlu0 %v1152_v14  ;;  %v3910_v12 = vld [vmem:[#allocation15_spill] sm:$0xff] }
 0x211   : > { %v1155_v3 = vadd.f32 %v3373_v4, %v3367_v28  ;;  %v3911_v14 = vld [vmem:[#allocation16_spill] sm:$0xff]  ;;  %v3914_v28 = vld [vmem:[#allocation18_spill] sm:$0xff] }
 0x212   : > { %2625 = vpow2.f32 %v1054_v63  ;;  %v1058_v16 = vmul.f32 1.442695, %v956_v39  ;;  %v1060_v55 = vmul.f32 1.442695, %v957_v42 }
 0x213   : > { %2627 = vpow2.f32 %v1056_v8  ;;  %1156 = vadd.xlane.f32.xlu1 %v1155_v3  ;;  %v3913_v3 = vld [vmem:[#allocation17_spill] sm:$0xff] }
 0x214   : > { %v3379_v48 = vpop.eup %2617  ;;  %2629 = vpow2.f32 %v1058_v16 }
 0x215   : > { %3907 = vst [vmem:[#allocation12_spill] sm:$0xff] %v3379_v48  ;;  %v3381_v10 = vpop.eup %2619  ;;  %2631 = vpow2.f32 %v1060_v55  ;;  %v884_v24 = vpop.xlane.xlu0 %883 }
 0x216   : > { %3908 = vst [vmem:[#allocation13_spill] sm:$0xff] %v3381_v10  ;;  %v3383_v23 = vpop.eup %2621  ;;  %v958_v62 = vsub.f32 %v3910_v12, %v884_v24  ;;  %v959_v38 = vsub.f32 %v3911_v14, %v884_v24  ;;  %v1158_v63 = vadd.f32 %v3381_v10, %v3379_v48 }
 0x217   : > { %3909 = vst [vmem:[#allocation14_spill] sm:$0xff] %v3383_v23  ;;  %v3389_v39 = vpop.eup %2623  ;;  %v887_v8 = vpop.xlane.xlu1 %886 }
 0x218   : > { %3912 = vst [vmem:[#allocation15_spill] sm:$0xff] %v3389_v39  ;;  %v1062_v2 = vmul.f32 1.442695, %v958_v62  ;;  %v1064_v42 = vmul.f32 1.442695, %v959_v38  ;;  %v960_v16 = vsub.f32 %v3913_v3, %v887_v8  ;;  %v961_v4 = vsub.f32 %v3914_v28, %v887_v8  ;;  %1159 = vadd.xlane.f32.xlu0 %v1158_v63  ;;  %v3915_v3 = vld [vmem:[#allocation19_spill] sm:$0xff] }
 0x219   : > { %v1161_v55 = vadd.f32 %v3389_v39, %v3383_v23  ;;  %v3916_v63 = vld [vmem:[#allocation20_spill] sm:$0xff]  ;;  %v3917_v23 = vld [vmem:[#allocation21_spill] sm:$0xff]  ;;  %v3918_v39 = vld [vmem:[#allocation22_spill] sm:$0xff] }
 0x21a   : > { %2633 = vpow2.f32 %v1062_v2  ;;  %v1066_v12 = vmul.f32 1.442695, %v960_v16  ;;  %v1068_v17 = vmul.f32 1.442695, %v961_v4 }
 0x21b   : > { %2635 = vpow2.f32 %v1064_v42  ;;  %1162 = vadd.xlane.f32.xlu1 %v1161_v55 }
 0x21c   : > { %v3395_v24 = vpop.eup %2625  ;;  %2637 = vpow2.f32 %v1066_v12 }
 0x21d   : > { %v3397_v14 = vpop.eup %2627  ;;  %2639 = vpow2.f32 %v1068_v17  ;;  %v890_v62 = vpop.xlane.xlu0 %889 }
 0x21e   : > { %v3399_v38 = vpop.eup %2629  ;;  %v962_v28 = vsub.f32 %v3915_v3, %v890_v62  ;;  %v963_v8 = vsub.f32 %v3916_v63, %v890_v62  ;;  %v1164_v2 = vadd.f32 %v3397_v14, %v3395_v24 }
 0x21f   : > { %v3405_v16 = vpop.eup %2631  ;;  %v893_v4 = vpop.xlane.xlu1 %892 }
 0x220   : > { %v1070_v42 = vmul.f32 1.442695, %v962_v28  ;;  %v1072_v55 = vmul.f32 1.442695, %v963_v8  ;;  %v964_v12 = vsub.f32 %v3917_v23, %v893_v4  ;;  %v965_v48 = vsub.f32 %v3918_v39, %v893_v4  ;;  %1165 = vadd.xlane.f32.xlu0 %v1164_v2 }
 0x221   : > { %v1167_v17 = vadd.f32 %v3405_v16, %v3399_v38 }
 0x222   : > { %2641 = vpow2.f32 %v1070_v42  ;;  %v1074_v3 = vmul.f32 1.442695, %v964_v12  ;;  %v1076_v10 = vmul.f32 1.442695, %v965_v48 }
 0x223   : > { %2643 = vpow2.f32 %v1072_v55  ;;  %1168 = vadd.xlane.f32.xlu1 %v1167_v17 }
 0x224   : > { %v3411_v62 = vpop.eup %2633  ;;  %2645 = vpow2.f32 %v1074_v3 }
 0x225   : > { %v3413_v63 = vpop.eup %2635  ;;  %2647 = vpow2.f32 %v1076_v10 }
 0x226   : > { %v3415_v28 = vpop.eup %2637  ;;  %v1170_v23 = vadd.f32 %v3413_v63, %v3411_v62 }
 0x227   : > { %3919 = vst [vmem:[#allocation16_spill] sm:$0xff] %v3415_v28  ;;  %v3419_v39 = vpop.eup %2639 }
 0x228   : > { %3920 = vst [vmem:[#allocation17_spill] sm:$0xff] %v3419_v39  ;;  %1171 = vadd.xlane.f32.xlu0 %v1170_v23  ;;  %v1173_v8 = vadd.f32 %v3419_v39, %v3415_v28 }
 0x22a   : > { %1174 = vadd.xlane.f32.xlu1 %v1173_v8 }
 0x22c   : > { %v3423_v48 = vpop.eup %2641 }
 0x22d   : > { %3921 = vst [vmem:[#allocation18_spill] sm:$0xff] %v3423_v48  ;;  %v3425_v2 = vpop.eup %2643 }
 0x22e   : > { %3922 = vst [vmem:[#allocation19_spill] sm:$0xff] %v3425_v2  ;;  %v3427_v4 = vpop.eup %2645  ;;  %v1176_v10 = vadd.f32 %v3425_v2, %v3423_v48 }
 0x22f   : > { %3923 = vst [vmem:[#allocation20_spill] sm:$0xff] %v3427_v4  ;;  %v3431_v42 = vpop.eup %2647 }
 0x230   : > { %3924 = vst [vmem:[#allocation21_spill] sm:$0xff] %v3431_v42  ;;  %1177 = vadd.xlane.f32.xlu0 %v1176_v10  ;;  %v1179_v55 = vadd.f32 %v3431_v42, %v3427_v4 }
 0x232   : > { %1180 = vadd.xlane.f32.xlu1 %v1179_v55 }
 0x265   : > { %v1112_v12 = vpop.xlane.xlu0 %1111 }
 0x266   : > { %2649 = vrcp.f32 %v1112_v12 }
 0x269   : > { %v1115_v17 = vpop.xlane.xlu1 %1114  ;;  %v896_v3 = vpop.xlane.xlu0 %895 }
 0x26a   : > { %2651 = vrcp.f32 %v1115_v17  ;;  %v966_v23 = vsub.f32 %v3149_v59, %v896_v3  ;;  %v967_v8 = vsub.f32 %v3151_v61, %v896_v3 }
 0x26c   : > { %v1078_v28 = vmul.f32 1.442695, %v966_v23  ;;  %v1080_v39 = vmul.f32 1.442695, %v967_v8 }
 0x26d   : > { %v1118_v48 = vpop.xlane.xlu0 %1117  ;;  %v899_v10 = vpop.xlane.xlu1 %898 }
 0x26e   : > { %2653 = vpow2.f32 %v1078_v28  ;;  %v968_v4 = vsub.f32 %v3153_v1, %v899_v10  ;;  %v969_v55 = vsub.f32 %v3157_v7, %v899_v10 }
 0x26f   : > { %2655 = vpow2.f32 %v1080_v39 }
 0x270   : > { %v2650_v12 = vpop.eup %2649  ;;  %2657 = vrcp.f32 %v1118_v48  ;;  %v1082_v17 = vmul.f32 1.442695, %v968_v4  ;;  %v1084_v59 = vmul.f32 1.442695, %v969_v55 }
 0x271   : > { %v1121_v42 = vpop.xlane.xlu1 %1120  ;;  %v902_v61 = vpop.xlane.xlu0 %901  ;;  %v1238_v3 = vmul.f32 %v2650_v12, %v3217_v36  ;;  %v1239_v23 = vmul.f32 %v2650_v12, %v3219_v26 }
 0x272   : > { %2659 = vpow2.f32 %v1082_v17  ;;  %v970_v28 = vsub.f32 %v3161_v13, %v902_v61  ;;  %v971_v1 = vsub.f32 %v3163_v15, %v902_v61 }
 0x273   : > { %2661 = vpow2.f32 %v1084_v59  ;;  %v2249_v7 = vpack.c.bf16 %v1239_v23, %v1238_v3 }
 0x274   : > { %v2652_v39 = vpop.eup %2651  ;;  %2663 = vrcp.f32 %v1121_v42  ;;  %v1086_v8 = vmul.f32 1.442695, %v970_v28  ;;  %v1088_v48 = vmul.f32 1.442695, %v971_v1 }
 0x275   : > { %v1124_v4 = vpop.xlane.xlu0 %1123  ;;  %v905_v10 = vpop.xlane.xlu1 %904  ;;  %v1240_v55 = vmul.f32 %v2652_v39, %v3225_v20  ;;  %v1241_v2 = vmul.f32 %v2652_v39, %v3229_v27  ;;  %1914 = vst [vmem:[%s3451_s7] sm:$0xff] %v2249_v7 }
 0x276   : > { %2665 = vpow2.f32 %v1086_v8  ;;  %v972_v13 = vsub.f32 %v3165_v19, %v905_v10  ;;  %v973_v15 = vsub.f32 %v3169_v25, %v905_v10 }
 0x277   : > { %2667 = vpow2.f32 %v1088_v48  ;;  %v1303_v36 = vpack.c.bf16 %v1241_v2, %v1239_v23  ;;  %v2250_v26 = vpack.c.bf16 %v1241_v2, %v1240_v55  ;;  %v1302_v42 = vpack.c.bf16 %v1240_v55, %v1238_v3 }
 0x278   : > { %v3456_v12 = vpop.eup %2653  ;;  %2669 = vrcp.f32 %v1124_v4  ;;  %v1090_v20 = vmul.f32 1.442695, %v972_v13  ;;  %v1092_v27 = vmul.f32 1.442695, %v973_v15 }
 0x279   : > { %v3458_v17 = vpop.eup %2655  ;;  %1494 = vmatprep.mubr.bf16.mxu1 %v1303_v36  ;;  %1915 = vst [vmem:[%s3451_s7 + $0x8] sm:$0xff] %v2250_v26  ;;  %v1127_v59 = vpop.xlane.xlu1 %1126 }
 0x27a   : > { %v908_v61 = vpop.xlane.xlu0 %907  ;;  %v2658_v28 = vpop.eup %2657  ;;  %2671 = vpow2.f32 %v1090_v20  ;;  %1495 = vmatmul.mubr.bf16.vlgmr.msra.gmra.mrb[0].mxu1 %v1302_v42  ;;  %v1182_v2 = vadd.f32 %v3458_v17, %v3456_v12 }
 0x27b   : > { %v974_v19 = vsub.f32 %v3173_v31, %v908_v61  ;;  %v975_v25 = vsub.f32 %v3175_v37, %v908_v61  ;;  %2673 = vpow2.f32 %v1092_v27  ;;  %v1243_v3 = vmul.f32 %v2658_v28, %v3238_v46 }
 0x27c   : > { %v1242_v23 = vmul.f32 %v2658_v28, %v3233_v35  ;;  %v3467_v1 = vpop.eup %2659  ;;  %2675 = vrcp.f32 %v1127_v59  ;;  %1183 = vadd.xlane.f32.xlu0 %v1182_v2 }
 0x27d   : > { %v1094_v7 = vmul.f32 1.442695, %v974_v19  ;;  %v1096_v39 = vmul.f32 1.442695, %v975_v25  ;;  %v3469_v8 = vpop.eup %2661  ;;  %v911_v37 = vpop.xlane.xlu1 %910 }
 0x27e   : > { %v1130_v31 = vpop.xlane.xlu0 %1129  ;;  %v2251_v48 = vpack.c.bf16 %v1243_v3, %v1242_v23  ;;  %v2664_v4 = vpop.eup %2663  ;;  %v976_v10 = vsub.f32 %v3177_v49, %v911_v37  ;;  %v977_v46 = vsub.f32 %v3181_v9, %v911_v37  ;;  %v1185_v35 = vadd.f32 %v3469_v8, %v3467_v1 }
 0x27f   : > { %2677 = vpow2.f32 %v1094_v7  ;;  %v1245_v55 = vmul.f32 %v2664_v4, %v3251_v50  ;;  %v1244_v13 = vmul.f32 %v2664_v4, %v3244_v22 }
 0x280   : > { %2679 = vpow2.f32 %v1096_v39  ;;  %1916 = vst [vmem:[%s3451_s7 + $0x10] sm:$0xff] %v2251_v48  ;;  %v3478_v15 = vpop.eup %2665  ;;  %v1098_v36 = vmul.f32 1.442695, %v976_v10  ;;  %v1100_v26 = vmul.f32 1.442695, %v977_v46  ;;  %1186 = vadd.xlane.f32.xlu1 %v1185_v35 }
 0x281   : > { %2681 = vrcp.f32 %v1130_v31  ;;  %v3480_v42 = vpop.eup %2667  ;;  %v1305_v49 = vpack.c.bf16 %v1245_v55, %v1243_v3  ;;  %v1133_v9 = vpop.xlane.xlu1 %1132  ;;  %v1304_v27 = vpack.c.bf16 %v1244_v13, %v1242_v23  ;;  %v2252_v59 = vpack.c.bf16 %v1245_v55, %v1244_v13 }
 0x282   : > { %v914_v20 = vpop.xlane.xlu0 %913  ;;  %v2670_v61 = vpop.eup %2669  ;;  %2683 = vpow2.f32 %v1098_v36  ;;  %v1188_v28 = vadd.f32 %v3480_v42, %v3478_v15 }
 0x283   : > { %v978_v50 = vsub.f32 %v3185_v21, %v914_v20  ;;  %v979_v22 = vsub.f32 %v3187_v53, %v914_v20  ;;  %2685 = vpow2.f32 %v1100_v26  ;;  %1502 = vmatprep.mubr.bf16.mxu1 %v1305_v49  ;;  %1917 = vst [vmem:[%s3451_s7 + $0x18] sm:$0xff] %v2252_v59  ;;  %v1247_v19 = vmul.f32 %v2670_v61, %v3260_v54 }
 0x284   : > { %v1246_v25 = vmul.f32 %v2670_v61, %v3255_v41  ;;  %v3489_v2 = vpop.eup %2671  ;;  %2687 = vrcp.f32 %v1133_v9  ;;  %1503 = vmatmul.mubr.bf16.gmra.mrb[4].mxu1 %v1304_v27  ;;  %1189 = vadd.xlane.f32.xlu0 %v1188_v28 }
 0x285   : > { %v1102_v3 = vmul.f32 1.442695, %v978_v50  ;;  %v1104_v23 = vmul.f32 1.442695, %v979_v22  ;;  %v3491_v21 = vpop.eup %2673  ;;  %v917_v7 = vpop.xlane.xlu1 %916 }
 0x286   : > { %v1136_v53 = vpop.xlane.xlu0 %1135  ;;  %v2253_v39 = vpack.c.bf16 %v1247_v19, %v1246_v25  ;;  %v2676_v31 = vpop.eup %2675  ;;  %v980_v37 = vsub.f32 %v3189_v47, %v917_v7  ;;  %v981_v54 = vsub.f32 %v3193_v43, %v917_v7  ;;  %v1191_v41 = vadd.f32 %v3491_v21, %v3489_v2 }
 0x287   : > { %2689 = vpow2.f32 %v1102_v3  ;;  %v1249_v48 = vmul.f32 %v2676_v31, %v3270_v33  ;;  %v1248_v4 = vmul.f32 %v2676_v31, %v3263_v44 }
 0x288   : > { %2691 = vpow2.f32 %v1104_v23  ;;  %1918 = vst [vmem:[%s3451_s7 + $0x20] sm:$0xff] %v2253_v39  ;;  %v1106_v46 = vmul.f32 1.442695, %v980_v37  ;;  %v1108_v35 = vmul.f32 1.442695, %v981_v54  ;;  %1192 = vadd.xlane.f32.xlu1 %v1191_v41 }
 0x289   : > { %v3500_v10 = vpop.eup %2677  ;;  %2693 = vrcp.f32 %v1136_v53  ;;  %v1307_v47 = vpack.c.bf16 %v1249_v48, %v1247_v19  ;;  %v1139_v43 = vpop.xlane.xlu1 %1138  ;;  %v1306_v13 = vpack.c.bf16 %v1248_v4, %v1246_v25  ;;  %v2254_v36 = vpack.c.bf16 %v1249_v48, %v1248_v4 }
 0x28a   : > { %v3502_v55 = vpop.eup %2679  ;;  %2695 = vpow2.f32 %v1106_v46 }
 0x28b   : > { %v2682_v26 = vpop.eup %2681  ;;  %v1194_v33 = vadd.f32 %v3502_v55, %v3500_v10  ;;  %2697 = vpow2.f32 %v1108_v35  ;;  %1510 = vmatprep.mubr.bf16.mxu1 %v1307_v47  ;;  %1919 = vst [vmem:[%s3451_s7 + $0x28] sm:$0xff] %v2254_v36 }
 0x28c   : > { %v1251_v44 = vmul.f32 %v2682_v26, %v3286_v40  ;;  %v1250_v49 = vmul.f32 %v2682_v26, %v3281_v58  ;;  %v3509_v9 = vpop.eup %2683  ;;  %2699 = vrcp.f32 %v1139_v43  ;;  %1511 = vmatmul.mubr.bf16.gmra.mrb[8].mxu1 %v1306_v13 }
 0x28d   : > { %1195 = vadd.xlane.f32.xlu0 %v1194_v33  ;;  %v3511_v20 = vpop.eup %2685  ;;  %v1142_v27 = vpop.xlane.xlu0 %1141 }
 0x28e   : > { %v2255_v59 = vpack.c.bf16 %v1251_v44, %v1250_v49  ;;  %v2688_v61 = vpop.eup %2687  ;;  %2701 = vrcp.f32 %v1142_v27  ;;  %v1197_v50 = vadd.f32 %v3511_v20, %v3509_v9 }
 0x28f   : > { %v1253_v22 = vmul.f32 %v2688_v61, %v3295_v32  ;;  %v1252_v40 = vmul.f32 %v2688_v61, %v3288_v52 }
 0x290   : > { %1920 = vst [vmem:[%s3451_s7 + $0x30] sm:$0xff] %v2255_v59  ;;  %1198 = vadd.xlane.f32.xlu1 %v1197_v50  ;;  %v1145_v28 = vpop.xlane.xlu1 %1144 }
 0x291   : > { %v3518_v58 = vpop.eup %2689  ;;  %2703 = vrcp.f32 %v1145_v28  ;;  %v1309_v25 = vpack.c.bf16 %v1253_v22, %v1251_v44  ;;  %v1308_v3 = vpack.c.bf16 %v1252_v40, %v1250_v49  ;;  %v2256_v23 = vpack.c.bf16 %v1253_v22, %v1252_v40 }
 0x292   : > { %v3520_v19 = vpop.eup %2691 }
 0x293   : > { %v2694_v53 = vpop.eup %2693  ;;  %v1200_v7 = vadd.f32 %v3520_v19, %v3518_v58  ;;  %1518 = vmatprep.mubr.bf16.mxu1 %v1309_v25  ;;  %1921 = vst [vmem:[%s3451_s7 + $0x38] sm:$0xff] %v2256_v23 }
 0x294   : > { %v1255_v52 = vmul.f32 %v2694_v53, %v3312_v18  ;;  %v1254_v32 = vmul.f32 %v2694_v53, %v3307_v0  ;;  %v3527_v39 = vpop.eup %2695  ;;  %1519 = vmatmul.mubr.bf16.gmra.mrb[12].mxu1 %v1308_v3  ;;  %v3925_v53 = vld [vmem:[#allocation9_spill] sm:$0xff] }
 0x295   : > { %1201 = vadd.xlane.f32.xlu0 %v1200_v7  ;;  %v3529_v31 = vpop.eup %2697  ;;  %v1148_v37 = vpop.xlane.xlu0 %1147 }
 0x296   : > { %v2257_v54 = vpack.c.bf16 %v1255_v52, %v1254_v32  ;;  %v2700_v41 = vpop.eup %2699  ;;  %2705 = vrcp.f32 %v1148_v37  ;;  %v1203_v48 = vadd.f32 %v3529_v31, %v3527_v39 }
 0x297   : > { %v1257_v4 = vmul.f32 %v2700_v41, %v3321_v45  ;;  %v1256_v18 = vmul.f32 %v2700_v41, %v3314_v60 }
 0x298   : > { %1922 = vst [vmem:[%s3451_s7 + $0x40] sm:$0xff] %v2257_v54  ;;  %v2702_v0 = vpop.eup %2701  ;;  %1204 = vadd.xlane.f32.xlu1 %v1203_v48  ;;  %v1151_v46 = vpop.xlane.xlu1 %1150  ;;  %v3927_v54 = vld [vmem:[#allocation10_spill] sm:$0xff] }
 0x299   : > { %2707 = vrcp.f32 %v1151_v46  ;;  %v1311_v35 = vpack.c.bf16 %v1257_v4, %v1255_v52  ;;  %v1310_v47 = vpack.c.bf16 %v1256_v18, %v1254_v32  ;;  %v2258_v43 = vpack.c.bf16 %v1257_v4, %v1256_v18  ;;  %v3928_v46 = vld [vmem:[#allocation13_spill] sm:$0xff] }
 0x29a   : > { %v1259_v13 = vmul.f32 %v2702_v0, %v3333_v6  ;;  %v1258_v36 = vmul.f32 %v2702_v0, %v3331_v56 }
 0x29b   : > { %v2704_v26 = vpop.eup %2703  ;;  %1526 = vmatprep.mubr.bf16.mxu1 %v1311_v35  ;;  %1923 = vst [vmem:[%s3451_s7 + $0x48] sm:$0xff] %v2258_v43 }
 0x29c   : > { %1527 = vmatmul.mubr.bf16.gmra.mrb[16].mxu1 %v1310_v47  ;;  %v1261_v60 = vmul.f32 %v2704_v26, %v3341_v51  ;;  %v1260_v45 = vmul.f32 %v2704_v26, %v3335_v57  ;;  %v2259_v33 = vpack.c.bf16 %v1259_v13, %v1258_v36  ;;  %v3929_v47 = vld [vmem:[#allocation12_spill] sm:$0xff] }
 0x29d   : > { %v1154_v44 = vpop.xlane.xlu0 %1153 }
 0x29e   : > { %2709 = vrcp.f32 %v1154_v44  ;;  %v1313_v49 = vpack.c.bf16 %v1261_v60, %v1259_v13  ;;  %v2260_v27 = vpack.c.bf16 %v1261_v60, %v1260_v45  ;;  %1924 = vst [vmem:[%s3451_s7 + $0x50] sm:$0xff] %v2259_v33  ;;  %v1312_v51 = vpack.c.bf16 %v1260_v45, %v1258_v36  ;;  %v3930_v60 = vld [vmem:[#allocation15_spill] sm:$0xff]  ;;  %v3931_v33 = vld [vmem:[#allocation14_spill] sm:$0xff] }
 0x2a0   : > { %v2706_v59 = vpop.eup %2705  ;;  %1534 = vmatprep.mubr.bf16.mxu1 %v1313_v49  ;;  %v1157_v6 = vpop.xlane.xlu1 %1156  ;;  %1925 = vst [vmem:[%s3451_s7 + $0x58] sm:$0xff] %v2260_v27 }
 0x2a1   : > { %2711 = vrcp.f32 %v1157_v6  ;;  %v1263_v56 = vmul.f32 %v2706_v59, %v3349_v34  ;;  %v1262_v61 = vmul.f32 %v2706_v59, %v3347_v11 }
 0x2a3   : > { %v2708_v50 = vpop.eup %2707  ;;  %v2261_v57 = vpack.c.bf16 %v1263_v56, %v1262_v61 }
 0x2a4   : > { %1535 = vmatmul.mubr.bf16.gmra.mrb[20].mxu1 %v1312_v51  ;;  %v1265_v22 = vmul.f32 %v2708_v50, %v3357_v5  ;;  %v1264_v40 = vmul.f32 %v2708_v50, %v3351_v29  ;;  %v3926_v29 = vld [vmem:[#allocation11_spill] sm:$0xff] }
 0x2a5   : > { %v1160_v28 = vpop.xlane.xlu0 %1159  ;;  %1926 = vst [vmem:[%s3451_s7 + $0x60] sm:$0xff] %v2261_v57 }
 0x2a6   : > { %2713 = vrcp.f32 %v1160_v28  ;;  %v1315_v25 = vpack.c.bf16 %v1265_v22, %v1263_v56  ;;  %v2262_v3 = vpack.c.bf16 %v1265_v22, %v1264_v40  ;;  %v1314_v52 = vpack.c.bf16 %v1264_v40, %v1262_v61 }
 0x2a8   : > { %v2710_v23 = vpop.eup %2709  ;;  %1542 = vmatprep.mubr.bf16.mxu1 %v1315_v25  ;;  %v1163_v34 = vpop.xlane.xlu1 %1162  ;;  %1927 = vst [vmem:[%s3451_s7 + $0x68] sm:$0xff] %v2262_v3 }
 0x2a9   : > { %2715 = vrcp.f32 %v1163_v34  ;;  %v1267_v11 = vmul.f32 %v2710_v23, %v3365_v30  ;;  %v1266_v7 = vmul.f32 %v2710_v23, %v3925_v53 }
 0x2ab   : > { %v2712_v5 = vpop.eup %2711  ;;  %v2263_v32 = vpack.c.bf16 %v1267_v11, %v1266_v7 }
 0x2ac   : > { %1543 = vmatmul.mubr.bf16.gmra.mrb[24].mxu1 %v1314_v52  ;;  %v1269_v37 = vmul.f32 %v2712_v5, %v3926_v29  ;;  %v1268_v41 = vmul.f32 %v2712_v5, %v3927_v54  ;;  %v3933_v52 = vld [vmem:[#allocation16_spill] sm:$0xff] }
 0x2ad   : > { %v1166_v48 = vpop.xlane.xlu0 %1165  ;;  %1928 = vst [vmem:[%s3451_s7 + $0x70] sm:$0xff] %v2263_v32 }
 0x2ae   : > { %2717 = vrcp.f32 %v1166_v48  ;;  %v1317_v4 = vpack.c.bf16 %v1269_v37, %v1267_v11  ;;  %v2264_v18 = vpack.c.bf16 %v1269_v37, %v1268_v41  ;;  %v1316_v13 = vpack.c.bf16 %v1268_v41, %v1266_v7  ;;  %v3932_v7 = vld [vmem:[#allocation17_spill] sm:$0xff]  ;;  %v3934_v41 = vld [vmem:[#allocation19_spill] sm:$0xff]  ;;  %v3935_v48 = vld [vmem:[#allocation18_spill] sm:$0xff] }
 0x2b0   : > { %v2714_v0 = vpop.eup %2713  ;;  %1550 = vmatprep.mubr.bf16.mxu1 %v1317_v4  ;;  %v1169_v30 = vpop.xlane.xlu1 %1168  ;;  %1929 = vst [vmem:[%s3451_s7 + $0x78] sm:$0xff] %v2264_v18 }
 0x2b1   : > { %2719 = vrcp.f32 %v1169_v30  ;;  %v1271_v35 = vmul.f32 %v2714_v0, %v3928_v46  ;;  %v1270_v43 = vmul.f32 %v2714_v0, %v3929_v47  ;;  %v3936_v0 = vld [vmem:[#allocation21_spill] sm:$0xff]  ;;  %v3937_v46 = vld [vmem:[#allocation20_spill] sm:$0xff] }
 0x2b3   : > { %v2716_v36 = vpop.eup %2715  ;;  %v2265_v26 = vpack.c.bf16 %v1271_v35, %v1270_v43 }
 0x2b4   : > { %1551 = vmatmul.mubr.bf16.gmra.mrb[28].mxu1 %v1316_v13  ;;  %v1273_v45 = vmul.f32 %v2716_v36, %v3930_v60  ;;  %v1272_v44 = vmul.f32 %v2716_v36, %v3931_v33 }
 0x2b5   : > { %v1172_v49 = vpop.xlane.xlu0 %1171  ;;  %1930 = vst [vmem:[%s3451_s7 + $0x80] sm:$0xff] %v2265_v26 }
 0x2b6   : > { %2721 = vrcp.f32 %v1172_v49  ;;  %v1319_v27 = vpack.c.bf16 %v1273_v45, %v1271_v35  ;;  %v2266_v59 = vpack.c.bf16 %v1273_v45, %v1272_v44  ;;  %v1318_v50 = vpack.c.bf16 %v1272_v44, %v1270_v43 }
 0x2b7   : > { %v1175_v6 = vpop.xlane.xlu1 %1174 }
 0x2b8   : > { %v2718_v56 = vpop.eup %2717  ;;  %1558 = vmatprep.mubr.bf16.mxu1 %v1319_v27  ;;  %2723 = vrcp.f32 %v1175_v6  ;;  %1931 = vst [vmem:[%s3451_s7 + $0x88] sm:$0xff] %v2266_v59 }
 0x2b9   : > { %v1275_v61 = vmul.f32 %v2718_v56, %v3397_v14  ;;  %v1274_v51 = vmul.f32 %v2718_v56, %v3395_v24 }
 0x2bb   : > { %v2720_v57 = vpop.eup %2719  ;;  %v2267_v22 = vpack.c.bf16 %v1275_v61, %v1274_v51 }
 0x2bc   : > { %1559 = vmatmul.mubr.bf16.gmra.mrb[32].mxu1 %v1318_v50  ;;  %v1277_v40 = vmul.f32 %v2720_v57, %v3405_v16  ;;  %v1276_v28 = vmul.f32 %v2720_v57, %v3399_v38 }
 0x2bd   : > { %v1178_v25 = vpop.xlane.xlu0 %1177  ;;  %1932 = vst [vmem:[%s3451_s7 + $0x90] sm:$0xff] %v2267_v22 }
 0x2be   : > { %2725 = vrcp.f32 %v1178_v25  ;;  %v1321_v3 = vpack.c.bf16 %v1277_v40, %v1275_v61  ;;  %v2268_v23 = vpack.c.bf16 %v1277_v40, %v1276_v28  ;;  %v1320_v16 = vpack.c.bf16 %v1276_v28, %v1274_v51 }
 0x2bf   : > { %v1181_v34 = vpop.xlane.xlu1 %1180 }
 0x2c0   : > { %v2722_v11 = vpop.eup %2721  ;;  %1566 = vmatprep.mubr.bf16.mxu1 %v1321_v3  ;;  %2727 = vrcp.f32 %v1181_v34  ;;  %1933 = vst [vmem:[%s3451_s7 + $0x98] sm:$0xff] %v2268_v23 }
 0x2c1   : > { %v1279_v24 = vmul.f32 %v2722_v11, %v3413_v63  ;;  %v1278_v14 = vmul.f32 %v2722_v11, %v3411_v62 }
 0x2c2   : > { %v2724_v53 = vpop.eup %2723 }
 0x2c3   : > { %v1281_v38 = vmul.f32 %v2724_v53, %v3932_v7  ;;  %v1280_v5 = vmul.f32 %v2724_v53, %v3933_v52  ;;  %v2269_v32 = vpack.c.bf16 %v1279_v24, %v1278_v14 }
 0x2c4   : > { %1567 = vmatmul.mubr.bf16.gmra.mrb[36].mxu1 %v1320_v16 }
 0x2c5   : > { %v1323_v29 = vpack.c.bf16 %v1281_v38, %v1279_v24  ;;  %v2270_v37 = vpack.c.bf16 %v1281_v38, %v1280_v5  ;;  %1934 = vst [vmem:[%s3451_s7 + $0xa0] sm:$0xff] %v2269_v32  ;;  %v1322_v18 = vpack.c.bf16 %v1280_v5, %v1278_v14 }
 0x2c7   : > { %1574 = vmatprep.mubr.bf16.mxu1 %v1323_v29  ;;  %1935 = vst [vmem:[%s3451_s7 + $0xa8] sm:$0xff] %v2270_v37 }
 0x2c8   : > { %v2726_v54 = vpop.eup %2725 }
 0x2c9   : > { %v1283_v63 = vmul.f32 %v2726_v54, %v3934_v41  ;;  %v1282_v62 = vmul.f32 %v2726_v54, %v3935_v48 }
 0x2ca   : > { %v2728_v4 = vpop.eup %2727 }
 0x2cb   : > { %v1285_v30 = vmul.f32 %v2728_v4, %v3936_v0  ;;  %v1284_v35 = vmul.f32 %v2728_v4, %v3937_v46  ;;  %v2271_v47 = vpack.c.bf16 %v1283_v63, %v1282_v62 }
 0x2cc   : > { %1575 = vmatmul.mubr.bf16.gmra.mrb[40].mxu1 %v1322_v18 }
 0x2cd   : > { %v1325_v43 = vpack.c.bf16 %v1285_v30, %v1283_v63  ;;  %v2272_v13 = vpack.c.bf16 %v1285_v30, %v1284_v35  ;;  %1936 = vst [vmem:[%s3451_s7 + $0xb0] sm:$0xff] %v2271_v47  ;;  %v1324_v36 = vpack.c.bf16 %v1284_v35, %v1282_v62  ;;  %v1657_v62 = vld [vmem:[%s3607_s16] sm:$0xff]  ;;  %v1658_v30 = vld [vmem:[%s3607_s16 + $0x8] sm:$0xff] }
 0x2cf   : > { %1582 = vmatprep.mubr.bf16.mxu1 %v1325_v43  ;;  %1937 = vst [vmem:[%s3451_s7 + $0xb8] sm:$0xff] %v2272_v13 }
 0x2d4   : > { %1583 = vmatmul.mubr.bf16.gmra.mrb[44].mxu1 %v1324_v36 }
 0x309   : > { %v1184_v26 = vpop.xlane.xlu0 %1183 }
 0x30a   : > { %2729 = vrcp.f32 %v1184_v26 }
 0x30d   : > { %v1187_v60 = vpop.xlane.xlu1 %1186 }
 0x30e   : > { %2731 = vrcp.f32 %v1187_v60  ;;  %v1659_v60 = vld [vmem:[%s3607_s16 + $0x10] sm:$0xff] }
 0x311   : > { %v1190_v45 = vpop.xlane.xlu0 %1189 }
 0x312   : > { %2733 = vrcp.f32 %v1190_v45 }
 0x314   : > { %v2730_v33 = vpop.eup %2729 }
 0x315   : > { %v1193_v44 = vpop.xlane.xlu1 %1192  ;;  %v1287_v49 = vmul.f32 %v2730_v33, %v3458_v17  ;;  %v1286_v27 = vmul.f32 %v2730_v33, %v3456_v12 }
 0x316   : > { %2735 = vrcp.f32 %v1193_v44 }
 0x317   : > { %v2273_v59 = vpack.c.bf16 %v1287_v49, %v1286_v27 }
 0x318   : > { %v2732_v6 = vpop.eup %2731 }
 0x319   : > { %v1289_v61 = vmul.f32 %v2732_v6, %v3469_v8  ;;  %v1288_v51 = vmul.f32 %v2732_v6, %v3467_v1  ;;  %1938 = vst [vmem:[%s3451_s7 + $0xc0] sm:$0xff] %v2273_v59 }
 0x31a   : > { %v1196_v56 = vpop.xlane.xlu0 %1195 }
 0x31b   : > { %2737 = vrcp.f32 %v1196_v56  ;;  %v1327_v50 = vpack.c.bf16 %v1289_v61, %v1287_v49  ;;  %v1326_v57 = vpack.c.bf16 %v1288_v51, %v1286_v27  ;;  %v2274_v22 = vpack.c.bf16 %v1289_v61, %v1288_v51  ;;  %v1660_v49 = vld [vmem:[%s3607_s16 + $0x18] sm:$0xff] }
 0x31c   : > { %v2734_v40 = vpop.eup %2733 }
 0x31d   : > { %1590 = vmatprep.mubr.bf16.mxu1 %v1327_v50  ;;  %v1199_v17 = vpop.xlane.xlu1 %1198  ;;  %1939 = vst [vmem:[%s3451_s7 + $0xc8] sm:$0xff] %v2274_v22  ;;  %v1291_v12 = vmul.f32 %v2734_v40, %v3480_v42  ;;  %v1290_v28 = vmul.f32 %v2734_v40, %v3478_v15 }
 0x31e   : > { %2739 = vrcp.f32 %v1199_v17  ;;  %1591 = vmatmul.mubr.bf16.gmra.mrb[48].mxu1 %v1326_v57  ;;  %v1661_v57 = vld [vmem:[%s3607_s16 + $0x20] sm:$0xff] }
 0x31f   : > { %v2275_v8 = vpack.c.bf16 %v1291_v12, %v1290_v28 }
 0x320   : > { %v2736_v25 = vpop.eup %2735 }
 0x321   : > { %v1293_v3 = vmul.f32 %v2736_v25, %v3491_v21  ;;  %v1292_v23 = vmul.f32 %v2736_v25, %v3489_v2  ;;  %1940 = vst [vmem:[%s3451_s7 + $0xd0] sm:$0xff] %v2275_v8 }
 0x322   : > { %v1202_v1 = vpop.xlane.xlu0 %1201 }
 0x323   : > { %2741 = vrcp.f32 %v1202_v1  ;;  %v1329_v34 = vpack.c.bf16 %v1293_v3, %v1291_v12  ;;  %v1328_v11 = vpack.c.bf16 %v1292_v23, %v1290_v28  ;;  %v2276_v24 = vpack.c.bf16 %v1293_v3, %v1292_v23  ;;  %v1662_v12 = vld [vmem:[%s3607_s16 + $0x28] sm:$0xff] }
 0x325   : > { %v2738_v14 = vpop.eup %2737  ;;  %1598 = vmatprep.mubr.bf16.mxu1 %v1329_v34  ;;  %v1205_v42 = vpop.xlane.xlu1 %1204  ;;  %1941 = vst [vmem:[%s3451_s7 + $0xd8] sm:$0xff] %v2276_v24 }
 0x326   : > { %v1295_v15 = vmul.f32 %v2738_v14, %v3502_v55  ;;  %v1294_v53 = vmul.f32 %v2738_v14, %v3500_v10  ;;  %2743 = vrcp.f32 %v1205_v42  ;;  %1599 = vmatmul.mubr.bf16.gmra.mrb[52].mxu1 %v1328_v11  ;;  %v1663_v11 = vld [vmem:[%s3607_s16 + $0x30] sm:$0xff] }
 0x328   : > { %v2277_v21 = vpack.c.bf16 %v1295_v15, %v1294_v53  ;;  %v2740_v16 = vpop.eup %2739 }
 0x329   : > { %v1297_v2 = vmul.f32 %v2740_v16, %v3511_v20  ;;  %v1296_v7 = vmul.f32 %v2740_v16, %v3509_v9 }
 0x32a   : > { %1942 = vst [vmem:[%s3451_s7 + $0xe0] sm:$0xff] %v2277_v21 }
 0x32b   : > { %v1331_v38 = vpack.c.bf16 %v1297_v2, %v1295_v15  ;;  %v1330_v52 = vpack.c.bf16 %v1296_v7, %v1294_v53  ;;  %v2278_v5 = vpack.c.bf16 %v1297_v2, %v1296_v7  ;;  %v1664_v15 = vld [vmem:[%s3607_s16 + $0x38] sm:$0xff] }
 0x32d   : > { %v2742_v32 = vpop.eup %2741  ;;  %1606 = vmatprep.mubr.bf16.mxu1 %v1331_v38  ;;  %1943 = vst [vmem:[%s3451_s7 + $0xe8] sm:$0xff] %v2278_v5  ;;  %v1665_v5 = vld [vmem:[%s3607_s16 + $0x40] sm:$0xff] }
 0x32e   : > { %v1299_v10 = vmul.f32 %v2742_v32, %v3520_v19  ;;  %v1298_v55 = vmul.f32 %v2742_v32, %v3518_v58  ;;  %1607 = vmatmul.mubr.bf16.gmra.mrb[56].mxu1 %v1330_v52 }
 0x330   : > { %v2279_v29 = vpack.c.bf16 %v1299_v10, %v1298_v55  ;;  %v2744_v37 = vpop.eup %2743 }
 0x331   : > { %v1301_v20 = vmul.f32 %v2744_v37, %v3529_v31  ;;  %v1300_v9 = vmul.f32 %v2744_v37, %v3527_v39  ;;  %v3609_v39 = vstv %s1623_s9  ;;  %s2857_s9 = smov [#allocation5]  }
 0x332   : > { %1944 = vst [vmem:[%s3451_s7 + $0xf0] sm:$0xff] %v2279_v29  ;;  %v1666_v29 = vld [vmem:[%s3607_s16 + $0x48] sm:$0xff]  ;;  %s2749_s13 = sshll.u32 %s2857_s9, 4  ;;  %s2750_s13 = int_to_ptr.vmem [resolvable:$false] %s2749_s13 }
 0x333   : > { %v1333_v54 = vpack.c.bf16 %v1301_v20, %v1299_v10  ;;  %v1332_v41 = vpack.c.bf16 %v1300_v9, %v1298_v55  ;;  %v2280_v63 = vpack.c.bf16 %v1301_v20, %v1300_v9  ;;  %p2752_p1 = scmp.lt.s32.totalorder %s3694_s21, %s2750_s13 }
 0x335   : > { %1614 = vmatprep.mubr.bf16.mxu1 %v1333_v54  ;;  %1945 = vst [vmem:[%s3451_s7 + $0xf8] sm:$0xff] %v2280_v63  ;;  %s2751_s7 = scalar_lea.vmem %s2750_s13, 8192 }
 0x336   : > { %1615 = vmatmul.mubr.bf16.gmra.mrb[60].mxu1 %v1332_v41  ;;  %p2753_p2 = scmp.lt.s32.totalorder %s2751_s7, %s2745_s29 }
 0x338   : > { %p2754_p3 = por %p2753_p2, %p2752_p1 }
 0x33a   : > { %p2755_p5 = pnand %p2754_p3, %p2748_p0 }
 0x34d   : > { %v2347_v19 = vpop.f32.mrb[0].mxu1 }
 0x34e   : > { %v2348_v58 = vpop.f32.mrb[1].mxu1 }
 0x34f   : > { %v2349_v31 = vadd.f32 %v2348_v58, %v2347_v19  ;;  %v2350_v48 = vpop.f32.mrb[2].mxu1  ;;  %v1667_v58 = vld [vmem:[%s3607_s16 + $0x50] sm:$0xff] }
 0x350   : > { %v2351_v4 = vpop.f32.mrb[3].mxu1 }
 0x351   : > { %v1625_v18 = vmul.f32 %v2349_v31, %v3609_v39  ;;  %v2352_v0 = vadd.f32 %v2351_v4, %v2350_v48  ;;  %v1668_v4 = vld [vmem:[%s3607_s16 + $0x58] sm:$0xff] }
 0x353   : > { %v1689_v46 = vadd.f32 %v1657_v62, %v1625_v18  ;;  %v1626_v35 = vmul.f32 %v2352_v0, %v3609_v39 }
 0x355   : > { %1722 = vst.msk [vmem:[%s3617_s12] sm:$0xff] %vm1721_vm0, %v1689_v46  ;;  %v1690_v47 = vadd.f32 %v1658_v30, %v1626_v35 }
 0x357   : > { %1723 = vst.msk [vmem:[%s3617_s12 + $0x8] sm:$0xff] %vm1721_vm0, %v1690_v47  ;;  %v2353_v43 = vpop.f32.mrb[4].mxu1 }
 0x358   : > { %v2354_v13 = vpop.f32.mrb[5].mxu1 }
 0x359   : > { %v2355_v36 = vadd.f32 %v2354_v13, %v2353_v43  ;;  %v2356_v26 = vpop.f32.mrb[6].mxu1  ;;  %v1669_v13 = vld [vmem:[%s3607_s16 + $0x60] sm:$0xff] }
 0x35a   : > { %v2357_v45 = vpop.f32.mrb[7].mxu1 }
 0x35b   : > { %v1627_v33 = vmul.f32 %v2355_v36, %v3609_v39  ;;  %v2358_v44 = vadd.f32 %v2357_v45, %v2356_v26  ;;  %v1670_v45 = vld [vmem:[%s3607_s16 + $0x68] sm:$0xff] }
 0x35d   : > { %v1691_v27 = vadd.f32 %v1659_v60, %v1627_v33  ;;  %v1628_v59 = vmul.f32 %v2358_v44, %v3609_v39 }
 0x35f   : > { %1724 = vst.msk [vmem:[%s3617_s12 + $0x10] sm:$0xff] %vm1721_vm0, %v1691_v27  ;;  %v1692_v6 = vadd.f32 %v1660_v49, %v1628_v59  ;;  %v2359_v56 = vpop.f32.mrb[8].mxu1 }
 0x360   : > { %v2360_v61 = vpop.f32.mrb[9].mxu1 }
 0x361   : > { %1725 = vst.msk [vmem:[%s3617_s12 + $0x18] sm:$0xff] %vm1721_vm0, %v1692_v6  ;;  %v2361_v51 = vadd.f32 %v2360_v61, %v2359_v56  ;;  %v2362_v50 = vpop.f32.mrb[10].mxu1  ;;  %v1671_v61 = vld [vmem:[%s3607_s16 + $0x70] sm:$0xff] }
 0x362   : > { %v2363_v22 = vpop.f32.mrb[11].mxu1 }
 0x363   : > { %v1629_v40 = vmul.f32 %v2361_v51, %v3609_v39  ;;  %v2364_v17 = vadd.f32 %v2363_v22, %v2362_v50  ;;  %v1672_v22 = vld [vmem:[%s3607_s16 + $0x78] sm:$0xff] }
 0x365   : > { %v1693_v28 = vadd.f32 %v1661_v57, %v1629_v40  ;;  %v1630_v8 = vmul.f32 %v2364_v17, %v3609_v39 }
 0x367   : > { %1726 = vst.msk [vmem:[%s3617_s12 + $0x20] sm:$0xff] %vm1721_vm0, %v1693_v28  ;;  %v1694_v25 = vadd.f32 %v1662_v12, %v1630_v8  ;;  %v2365_v1 = vpop.f32.mrb[12].mxu1 }
 0x368   : > { %v2366_v3 = vpop.f32.mrb[13].mxu1 }
 0x369   : > { %1727 = vst.msk [vmem:[%s3617_s12 + $0x28] sm:$0xff] %vm1721_vm0, %v1694_v25  ;;  %v2367_v23 = vadd.f32 %v2366_v3, %v2365_v1  ;;  %v2368_v34 = vpop.f32.mrb[14].mxu1  ;;  %v1673_v3 = vld [vmem:[%s3607_s16 + $0x80] sm:$0xff] }
 0x36a   : > { %v2369_v24 = vpop.f32.mrb[15].mxu1 }
 0x36b   : > { %v1631_v14 = vmul.f32 %v2367_v23, %v3609_v39  ;;  %v2370_v42 = vadd.f32 %v2369_v24, %v2368_v34  ;;  %v1674_v24 = vld [vmem:[%s3607_s16 + $0x88] sm:$0xff] }
 0x36d   : > { %v1695_v53 = vadd.f32 %v1663_v11, %v1631_v14  ;;  %v1632_v21 = vmul.f32 %v2370_v42, %v3609_v39 }
 0x36f   : > { %1728 = vst.msk [vmem:[%s3617_s12 + $0x30] sm:$0xff] %vm1721_vm0, %v1695_v53  ;;  %v1696_v16 = vadd.f32 %v1664_v15, %v1632_v21  ;;  %v2371_v2 = vpop.f32.mrb[16].mxu1 }
 0x370   : > { %v2372_v7 = vpop.f32.mrb[17].mxu1 }
 0x371   : > { %1729 = vst.msk [vmem:[%s3617_s12 + $0x38] sm:$0xff] %vm1721_vm0, %v1696_v16  ;;  %v2373_v38 = vadd.f32 %v2372_v7, %v2371_v2  ;;  %v2374_v52 = vpop.f32.mrb[18].mxu1 }
 0x372   : > { %v2375_v32 = vpop.f32.mrb[19].mxu1 }
 0x373   : > { %v1633_v10 = vmul.f32 %v2373_v38, %v3609_v39  ;;  %v2376_v55 = vadd.f32 %v2375_v32, %v2374_v52 }
 0x375   : > { %v1697_v37 = vadd.f32 %v1665_v5, %v1633_v10  ;;  %v1634_v20 = vmul.f32 %v2376_v55, %v3609_v39 }
 0x377   : > { %1730 = vst.msk [vmem:[%s3617_s12 + $0x40] sm:$0xff] %vm1721_vm0, %v1697_v37  ;;  %v1698_v9 = vadd.f32 %v1666_v29, %v1634_v20  ;;  %v2377_v54 = vpop.f32.mrb[20].mxu1 }
 0x378   : > { %v2378_v41 = vpop.f32.mrb[21].mxu1 }
 0x379   : > { %1731 = vst.msk [vmem:[%s3617_s12 + $0x48] sm:$0xff] %vm1721_vm0, %v1698_v9  ;;  %v2379_v63 = vadd.f32 %v2378_v41, %v2377_v54  ;;  %v2380_v19 = vpop.f32.mrb[22].mxu1 }
 0x37a   : > { %v2381_v31 = vpop.f32.mrb[23].mxu1 }
 0x37b   : > { %v1635_v48 = vmul.f32 %v2379_v63, %v3609_v39  ;;  %v2382_v62 = vadd.f32 %v2381_v31, %v2380_v19 }
 0x37d   : > { %v1699_v18 = vadd.f32 %v1667_v58, %v1635_v48  ;;  %v1636_v0 = vmul.f32 %v2382_v62, %v3609_v39 }
 0x37f   : > { %1732 = vst.msk [vmem:[%s3617_s12 + $0x50] sm:$0xff] %vm1721_vm0, %v1699_v18  ;;  %v1700_v30 = vadd.f32 %v1668_v4, %v1636_v0  ;;  %v2383_v46 = vpop.f32.mrb[24].mxu1 }
 0x380   : > { %v2384_v35 = vpop.f32.mrb[25].mxu1 }
 0x381   : > { %1733 = vst.msk [vmem:[%s3617_s12 + $0x58] sm:$0xff] %vm1721_vm0, %v1700_v30  ;;  %v2385_v47 = vadd.f32 %v2384_v35, %v2383_v46  ;;  %v2386_v43 = vpop.f32.mrb[26].mxu1 }
 0x382   : > { %v2387_v36 = vpop.f32.mrb[27].mxu1 }
 0x383   : > { %v1637_v26 = vmul.f32 %v2385_v47, %v3609_v39  ;;  %v2388_v60 = vadd.f32 %v2387_v36, %v2386_v43 }
 0x385   : > { %v1701_v33 = vadd.f32 %v1669_v13, %v1637_v26  ;;  %v1638_v44 = vmul.f32 %v2388_v60, %v3609_v39 }
 0x387   : > { %1734 = vst.msk [vmem:[%s3617_s12 + $0x60] sm:$0xff] %vm1721_vm0, %v1701_v33  ;;  %v1702_v49 = vadd.f32 %v1670_v45, %v1638_v44  ;;  %v2389_v27 = vpop.f32.mrb[28].mxu1 }
 0x388   : > { %v2390_v59 = vpop.f32.mrb[29].mxu1 }
 0x389   : > { %1735 = vst.msk [vmem:[%s3617_s12 + $0x68] sm:$0xff] %vm1721_vm0, %v1702_v49  ;;  %v2391_v6 = vadd.f32 %v2390_v59, %v2389_v27  ;;  %v2392_v56 = vpop.f32.mrb[30].mxu1 }
 0x38a   : > { %v2393_v51 = vpop.f32.mrb[31].mxu1 }
 0x38b   : > { %v1639_v50 = vmul.f32 %v2391_v6, %v3609_v39  ;;  %v2394_v57 = vadd.f32 %v2393_v51, %v2392_v56 }
 0x38d   : > { %v1703_v40 = vadd.f32 %v1671_v61, %v1639_v50  ;;  %v1640_v17 = vmul.f32 %v2394_v57, %v3609_v39 }
 0x38f   : > { %1736 = vst.msk [vmem:[%s3617_s12 + $0x70] sm:$0xff] %vm1721_vm0, %v1703_v40  ;;  %v1704_v12 = vadd.f32 %v1672_v22, %v1640_v17  ;;  %v2395_v28 = vpop.f32.mrb[32].mxu1 }
 0x390   : > { %v2396_v8 = vpop.f32.mrb[33].mxu1 }
 0x391   : > { %1737 = vst.msk [vmem:[%s3617_s12 + $0x78] sm:$0xff] %vm1721_vm0, %v1704_v12  ;;  %v2397_v25 = vadd.f32 %v2396_v8, %v2395_v28  ;;  %v2398_v1 = vpop.f32.mrb[34].mxu1 }
 0x392   : > { %v2399_v23 = vpop.f32.mrb[35].mxu1 }
 0x393   : > { %v1641_v34 = vmul.f32 %v2397_v25, %v3609_v39  ;;  %v2400_v11 = vadd.f32 %v2399_v23, %v2398_v1 }
 0x395   : > { %v1705_v14 = vadd.f32 %v1673_v3, %v1641_v34  ;;  %v1642_v42 = vmul.f32 %v2400_v11, %v3609_v39 }
 0x397   : > { %1738 = vst.msk [vmem:[%s3617_s12 + $0x80] sm:$0xff] %vm1721_vm0, %v1705_v14  ;;  %v1706_v15 = vadd.f32 %v1674_v24, %v1642_v42  ;;  %v2401_v53 = vpop.f32.mrb[36].mxu1 }
 0x398   : > { %v2402_v21 = vpop.f32.mrb[37].mxu1 }
 0x399   : > { %1739 = vst.msk [vmem:[%s3617_s12 + $0x88] sm:$0xff] %vm1721_vm0, %v1706_v15  ;;  %v2403_v16 = vadd.f32 %v2402_v21, %v2401_v53  ;;  %v2404_v2 = vpop.f32.mrb[38].mxu1 }
 0x39a   : > { %2758 = shalt.err (!%p2755_p5)
}
 0x39b   : > { %s2759_s14 = scalar_lea.hbm %s3691_s20, 4096  ;;  %s2763_s19 = scalar_lea.hbm %s3846_s6, 8192 }
 0x39c   : > { %p2760_p6 = scmp.ne.s32.totalorder %s3691_s20, %s2759_s14  ;;  %p2764_p10 = scmp.lt.u32.totalorder %s3691_s20, %s3846_s6 }
 0x39d   : > { %p2765_p11 = scmp.lt.u32.totalorder %s2763_s19, %s2759_s14  ;;  %p2767_p13 = scmp.lt.u32.totalorder %s2759_s14, %s3691_s20 }
 0x39e   : > { %p2761_p7 = pnand %p2760_p6, %p2939_p4 }
 0x39f   : > { %p2766_p12 = por %p2765_p11, %p2764_p10 }
 0x3a0   : > { %p2762_p9 = pneg %p2761_p7 }
 0x3a1   : > { %p2768_p0 = por %p2767_p13, %p2766_p12 }
 0x3a3   : > { %p2769_p1 = pnand %p2768_p0, %p2762_p9 }
 0x3a5   : > { %2772 = shalt.err (!%p2769_p1)
}
 0x3a6   : > { %s2858_s29 = smov 128   ;;  %s2859_s7 = smov 8   ;;  %v1675_v7 = vld [vmem:[%s3607_s16 + $0x90] sm:$0xff]  ;;  %v2405_v38 = vpop.f32.mrb[39].mxu1  ;;  %v1643_v52 = vmul.f32 %v2403_v16, %v3609_v39  ;;  %v1676_v32 = vld [vmem:[%s3607_s16 + $0x98] sm:$0xff]  ;;  %v1677_v41 = vld [vmem:[%s3607_s16 + $0xa0] sm:$0xff] }
 0x3a7   : > { %2444 = dma.vmem_to_hbm [thread:$0]  (%p2939_p4), %s3694_s21, 4096, %s3691_s20, %s1952_s22, %s2858_s29, %s2858_s29, %s2859_s7   ;;  %v2406_v5 = vadd.f32 %v2405_v38, %v2404_v2  ;;  %v2407_v37 = vpop.f32.mrb[40].mxu1 }
 0x3a8   : > { %v1707_v10 = vadd.f32 %v1675_v7, %v1643_v52  ;;  %v2408_v20 = vpop.f32.mrb[41].mxu1  ;;  %v1678_v31 = vld [vmem:[%s3607_s16 + $0xa8] sm:$0xff]  ;;  %v1679_v35 = vld [vmem:[%s3607_s16 + $0xb0] sm:$0xff]  ;;  %v1680_v36 = vld [vmem:[%s3607_s16 + $0xb8] sm:$0xff]  ;;  %s1967_s20 = sshll.u32 %s3617_s12, 4  ;;  %s3785_s14 = scalar_lea.hbm %s3845_s5, %s2281_s17  ;;  %s3787_s20 = int_to_ptr.vmem [resolvable:$true] %s1967_s20 }
 0x3a9   : > { %v1644_v55 = vmul.f32 %v2406_v5, %v3609_v39  ;;  %v2409_v9 = vadd.f32 %v2408_v20, %v2407_v37  ;;  %v2410_v54 = vpop.f32.mrb[42].mxu1  ;;  %v1681_v59 = vld [vmem:[%s3607_s16 + $0xc0] sm:$0xff]  ;;  %v1682_v51 = vld [vmem:[%s3607_s16 + $0xc8] sm:$0xff]  ;;  %v1683_v8 = vld [vmem:[%s3607_s16 + $0xd0] sm:$0xff]  ;;  %s2773_s15 = scalar_lea.vmem %s3787_s20, 4096  ;;  %s2860_s18 = smov [#allocation3]  }
 0x3aa   : > { %1740 = vst.msk [vmem:[%s3617_s12 + $0x90] sm:$0xff] %vm1721_vm0, %v1707_v10  ;;  %v2411_v63 = vpop.f32.mrb[43].mxu1  ;;  %v1684_v23 = vld [vmem:[%s3607_s16 + $0xd8] sm:$0xff]  ;;  %v1685_v21 = vld [vmem:[%s3607_s16 + $0xe0] sm:$0xff]  ;;  %v1686_v38 = vld [vmem:[%s3607_s16 + $0xe8] sm:$0xff]  ;;  %p2774_p2 = scmp.ne.s32.totalorder %s3787_s20, %s2773_s15  ;;  %s2777_s26 = sshll.u32 %s2860_s18, 4  ;;  %s2778_s26 = int_to_ptr.vmem [resolvable:$false] %s2777_s26 }
 0x3ab   : > { %v1708_v29 = vadd.f32 %v1676_v32, %v1644_v55  ;;  %v1645_v19 = vmul.f32 %v2409_v9, %v3609_v39  ;;  %v2412_v58 = vadd.f32 %v2411_v63, %v2410_v54  ;;  %v2413_v18 = vpop.f32.mrb[44].mxu1  ;;  %v1687_v20 = vld [vmem:[%s3607_s16 + $0xf0] sm:$0xff]  ;;  %v1688_v63 = vld [vmem:[%s3607_s16 + $0xf8] sm:$0xff]  ;;  %s1947_s16 = scalar_lea.sflag [#allocation4], %s3438_s4  ;;  %s2779_s19 = scalar_lea.vmem %s2778_s26, 8192 }
 0x3ac   : > { %v2414_v0 = vpop.f32.mrb[45].mxu1  ;;  %p2775_p3 = pnand %p2774_p2, %p2939_p4  ;;  %p2780_p6 = scmp.lt.s32.totalorder %s3787_s20, %s2778_s26 }
 0x3ad   : > { %1741 = vst.msk [vmem:[%s3617_s12 + $0x98] sm:$0xff] %vm1721_vm0, %v1708_v29  ;;  %v1709_v48 = vadd.f32 %v1677_v41, %v1645_v19  ;;  %v1646_v62 = vmul.f32 %v2412_v58, %v3609_v39  ;;  %v2415_v30 = vadd.f32 %v2414_v0, %v2413_v18  ;;  %v2416_v46 = vpop.f32.mrb[46].mxu1  ;;  %p2781_p7 = scmp.lt.s32.totalorder %s2779_s19, %s2773_s15 }
 0x3ae   : > { %v2417_v47 = vpop.f32.mrb[47].mxu1  ;;  %p2776_p5 = pneg %p2775_p3 }
 0x3af   : > { %1742 = vst.msk [vmem:[%s3617_s12 + $0xa0] sm:$0xff] %vm1721_vm0, %v1709_v48  ;;  %v1710_v4 = vadd.f32 %v1678_v31, %v1646_v62  ;;  %v1647_v43 = vmul.f32 %v2415_v30, %v3609_v39  ;;  %v2418_v13 = vadd.f32 %v2417_v47, %v2416_v46  ;;  %p2782_p9 = por %p2781_p7, %p2780_p6 }
 0x3b1   : > { %1743 = vst.msk [vmem:[%s3617_s12 + $0xa8] sm:$0xff] %vm1721_vm0, %v1710_v4  ;;  %v1711_v26 = vadd.f32 %v1679_v35, %v1647_v43  ;;  %v1648_v60 = vmul.f32 %v2418_v13, %v3609_v39  ;;  %p2783_p10 = pnand %p2782_p9, %p2776_p5 }
 0x3b3   : > { %1744 = vst.msk [vmem:[%s3617_s12 + $0xb0] sm:$0xff] %vm1721_vm0, %v1711_v26  ;;  %v1712_v45 = vadd.f32 %v1680_v36, %v1648_v60 }
 0x3b5   : > { %1745 = vst.msk [vmem:[%s3617_s12 + $0xb8] sm:$0xff] %vm1721_vm0, %v1712_v45 }
 0x3f1   : > { %v2419_v33 = vpop.f32.mrb[48].mxu1 }
 0x3f2   : > { %v2420_v44 = vpop.f32.mrb[49].mxu1 }
 0x3f3   : > { %v2421_v49 = vadd.f32 %v2420_v44, %v2419_v33  ;;  %v2422_v27 = vpop.f32.mrb[50].mxu1 }
 0x3f4   : > { %v2423_v6 = vpop.f32.mrb[51].mxu1 }
 0x3f5   : > { %v1649_v56 = vmul.f32 %v2421_v49, %v3609_v39  ;;  %v2424_v61 = vadd.f32 %v2423_v6, %v2422_v27 }
 0x3f7   : > { %v1713_v50 = vadd.f32 %v1681_v59, %v1649_v56  ;;  %v1650_v57 = vmul.f32 %v2424_v61, %v3609_v39 }
 0x3f9   : > { %1746 = vst.msk [vmem:[%s3617_s12 + $0xc0] sm:$0xff] %vm1721_vm0, %v1713_v50  ;;  %v1714_v22 = vadd.f32 %v1682_v51, %v1650_v57  ;;  %v2425_v40 = vpop.f32.mrb[52].mxu1 }
 0x3fa   : > { %v2426_v17 = vpop.f32.mrb[53].mxu1 }
 0x3fb   : > { %1747 = vst.msk [vmem:[%s3617_s12 + $0xc8] sm:$0xff] %vm1721_vm0, %v1714_v22  ;;  %v2427_v12 = vadd.f32 %v2426_v17, %v2425_v40  ;;  %v2428_v28 = vpop.f32.mrb[54].mxu1 }
 0x3fc   : > { %v2429_v25 = vpop.f32.mrb[55].mxu1 }
 0x3fd   : > { %v1651_v1 = vmul.f32 %v2427_v12, %v3609_v39  ;;  %v2430_v3 = vadd.f32 %v2429_v25, %v2428_v28 }
 0x3ff   : > { %v1715_v34 = vadd.f32 %v1683_v8, %v1651_v1  ;;  %v1652_v11 = vmul.f32 %v2430_v3, %v3609_v39 }
 0x401   : > { %1748 = vst.msk [vmem:[%s3617_s12 + $0xd0] sm:$0xff] %vm1721_vm0, %v1715_v34  ;;  %v1716_v24 = vadd.f32 %v1684_v23, %v1652_v11  ;;  %v2431_v14 = vpop.f32.mrb[56].mxu1 }
 0x402   : > { %v2432_v42 = vpop.f32.mrb[57].mxu1 }
 0x403   : > { %1749 = vst.msk [vmem:[%s3617_s12 + $0xd8] sm:$0xff] %vm1721_vm0, %v1716_v24  ;;  %v2433_v15 = vadd.f32 %v2432_v42, %v2431_v14  ;;  %v2434_v53 = vpop.f32.mrb[58].mxu1 }
 0x404   : > { %v2435_v16 = vpop.f32.mrb[59].mxu1 }
 0x405   : > { %v1653_v2 = vmul.f32 %v2433_v15, %v3609_v39  ;;  %v2436_v7 = vadd.f32 %v2435_v16, %v2434_v53 }
 0x407   : > { %v1717_v52 = vadd.f32 %v1685_v21, %v1653_v2  ;;  %v1654_v5 = vmul.f32 %v2436_v7, %v3609_v39 }
 0x409   : > { %1750 = vst.msk [vmem:[%s3617_s12 + $0xe0] sm:$0xff] %vm1721_vm0, %v1717_v52  ;;  %v1718_v32 = vadd.f32 %v1686_v38, %v1654_v5  ;;  %v2437_v10 = vpop.f32.mrb[60].mxu1 }
 0x40a   : > { %v2438_v55 = vpop.f32.mrb[61].mxu1 }
 0x40b   : > { %1751 = vst.msk [vmem:[%s3617_s12 + $0xe8] sm:$0xff] %vm1721_vm0, %v1718_v32  ;;  %v2439_v29 = vadd.f32 %v2438_v55, %v2437_v10  ;;  %v2440_v37 = vpop.f32.mrb[62].mxu1 }
 0x40c   : > { %v2441_v9 = vpop.f32.mrb[63].mxu1 }
 0x40d   : > { %v1655_v54 = vmul.f32 %v2439_v29, %v3609_v39  ;;  %v2442_v41 = vadd.f32 %v2441_v9, %v2440_v37 }
 0x40f   : > { %v1719_v19 = vadd.f32 %v1687_v20, %v1655_v54  ;;  %v1656_v58 = vmul.f32 %v2442_v41, %v3609_v39 }
 0x411   : > { %1752 = vst.msk [vmem:[%s3617_s12 + $0xf0] sm:$0xff] %vm1721_vm0, %v1719_v19  ;;  %v1720_v31 = vadd.f32 %v1688_v63, %v1656_v58 }
 0x413   : > { %1753 = vst.msk [vmem:[%s3617_s12 + $0xf8] sm:$0xff] %vm1721_vm0, %v1720_v31 }
 0x414   : > { %2786 = shalt.err (!%p2783_p10)
}
 0x415   : > { %s2787_s12 = scalar_lea.hbm %s3785_s14, 4096  ;;  %s2791_s13 = scalar_lea.hbm %s3845_s5, 8192 }
 0x416   : > { %p2788_p11 = scmp.ne.s32.totalorder %s3785_s14, %s2787_s12  ;;  %p2792_p0 = scmp.lt.u32.totalorder %s3785_s14, %s3845_s5 }
 0x417   : > { %p2793_p1 = scmp.lt.u32.totalorder %s2791_s13, %s2787_s12  ;;  %p2795_p3 = scmp.lt.u32.totalorder %s2787_s12, %s3785_s14 }
 0x418   : > { %p2789_p12 = pnand %p2788_p11, %p2939_p4 }
 0x419   : > { %p2794_p2 = por %p2793_p1, %p2792_p0 }
 0x41a   : > { %p2790_p13 = pneg %p2789_p12 }
 0x41b   : > { %p2796_p5 = por %p2795_p3, %p2794_p2 }
 0x41d   : > { %p2797_p6 = pnand %p2796_p5, %p2790_p13 }
 0x41f   : > { %2800 = shalt.err (!%p2797_p6)
}
 0x420   : > { %2443 = dma.vmem_to_hbm [thread:$0]  (%p2939_p4), %s3787_s20, 4096, %s3785_s14, %s1947_s16, %s2858_s29, %s2858_s29, %s2859_s7  }
 0x421 PF: > { %p2454_p7 = scmp.ge.s32.totalorder %s2855_s28, 2  ;;  %s2001_s15 = sand.u32 1, %s2835_s23  }
 0x422   : > { %s2002_s18 = scalar_lea.sflag [#allocation4], %s2001_s15 }
 0x423   : > { %p2448_p9 = pnand %p2454_p7, %p2946_p8 }
 0x425   : > { %2826 = dma.done.wait (!%p2448_p9), %s2002_s18, 4096  }
 0x426   : > { %2828 = vsyncadd (!%p2448_p9), %s2002_s18, 4294963200  ;;  %s2011_s8 = scalar_lea.sflag [#allocation6], %s2001_s15 }
 0x427   : > { %2830 = dma.done.wait (!%p2448_p9), %s2011_s8, 4096  }
 0x428   : > { %2832 = vsyncadd (!%p2448_p9), %s2011_s8, 4294963200  ;;  %s24_s28 = sadd.s32 1, %s2855_s28   ;;  %s3938_s23 = smov %s2839_s24 }
 0x429   : > { %p21_p10 = scmp.ge.s32.totalorder %s24_s28, 4   ;;  %s3939_s24 = smov %s2843_s25 }
 0x42a   : > { %s3940_s25 = smov %s2952_s11  ;;  %s3941_s26 = smov %s2851_s27 }
 0x42b   : > { %s3942_s27 = smov %s3944_s30  ;;  %23 = sbr.rel (!%p21_p10) target bundleno = 8 (0x8), region = 101 }
 0x432   :  { %2016 = vsyncpa [#allocation4], 1 }
 0x433   :  { %2018 = vsyncpa [#allocation4 + $0x1], 1 }
 0x434   :  { %2019 = vsyncpa [#allocation6], 1 }
 0x435   :  { %2021 = vsyncpa [#allocation6 + $0x1], 1 }

</bundles_post_ra>
